<compile_context>
chip_gen: v7x
topology: tpu7x:2x2x1
jax: 0.10.0
libtpu: 0.0.40
codegen_flags: <defaults>
</compile_context>

<pallas_src>
import jax
import jax.numpy as jnp
from jax.experimental import pallas as pl
from jax.experimental.pallas import tpu as pltpu


def _emit_scores(V, bias, h1_ref, h2_ref, h3_ref, h4_ref, out_ref):
    """Score one row tile and store it lane-dense.

    V       : (dim, 2) in the h dtype; columns are W@c1 and W@c2.
    bias    : f32 scalar (from SMEM).
    out_ref : (4, tile_n) f32 block; row r holds sc_{r+1} for this tile.
    """
    v0 = V[:, 0:1]
    v1 = V[:, 1:2]

    def matvec(h_ref, v):
        return jnp.dot(h_ref[...], v, preferred_element_type=jnp.float32)

    # torch.cat order: (fn(h2,c1), fn(h1,c2), fn(h4,c1), fn(h3,c2))
    s = jnp.concatenate(
        [matvec(h2_ref, v0), matvec(h1_ref, v1),
         matvec(h4_ref, v0), matvec(h3_ref, v1)], axis=1)       # (tile_n, 4) f32
    # One bias add, one small XLU transpose, one unmasked lane-dense store.
    out_ref[...] = jnp.transpose(s + bias, (1, 0))              # (4, tile_n)


def _disc_kernel_fused(w_ref, c_ref, b_ref, h1_ref, h2_ref, h3_ref, h4_ref,
                       out_ref):
    # Recompute V = W @ [c1 | c2] each grid step (dim*dim*2 MACs: negligible vs.
    # streamed h bytes); W/C are grid-invariant blocks, so they're DMA'd once.
    V = jnp.dot(w_ref[...], c_ref[...], preferred_element_type=jnp.float32)
    _emit_scores(V.astype(h1_ref.dtype), b_ref[0, 0],
                 h1_ref, h2_ref, h3_ref, h4_ref, out_ref)


def _disc_kernel_prev(v_ref, b_ref, h1_ref, h2_ref, h3_ref, h4_ref, out_ref):
    _emit_scores(v_ref[...], b_ref[0, 0],
                 h1_ref, h2_ref, h3_ref, h4_ref, out_ref)


def discriminator_forward(c1, c2, h1, h2, h3, h4, W, bias, *, tile_n=1024):
    """JAX wrapper reproducing Discriminator.forward semantics.

    c1, c2 : (dim,) or (1, dim);  h1..h4 : (N, dim);  W : (dim, dim);  bias : ()
    returns: (4*N,) float32 logits == torch.cat((sc_1, sc_2, sc_3, sc_4)).
    """
    N, dim = h1.shape
    f32 = jnp.float32

    C = jnp.stack([jnp.reshape(c1, (dim,)), jnp.reshape(c2, (dim,))],
                  axis=1).astype(W.dtype)                      # (dim, 2)
    b2 = jnp.reshape(bias, (1, 1)).astype(f32)                 # SMEM scalar

    # ---- row-tile selection --------------------------------------------------
    # Output blocks are (4, tile_n): keep tile_n a multiple of 128 (lane-dense,
    # satisfies the (8,128) rule for every input dtype) unless a single
    # full-extent tile covers N.  Keep >= 2 grid steps when possible so v7x's
    # two TensorCores both stream (the row axis is "parallel").
    if N < 256:
        tile_n = N                                             # one full-extent tile
    else:
        req = max(128, (min(tile_n, N) // 128) * 128)
        half = ((pl.cdiv(N, 2) + 127) // 128) * 128            # >= 2 grid steps
        tile_n = min(req, half)
    grid = (pl.cdiv(N, tile_n),)

    # ---- fuse W into the main kernel when it comfortably fits VMEM -----------
    w_bytes = 2 * (dim * dim + dim * 2) * jnp.dtype(W.dtype).itemsize
    fuse_w = w_bytes <= 12 * (1 << 20)                         # safe even on v7x
    # TODO(synk): for dim too large to hold W in VMEM, tile W's rows with a
    # dedicated pre-contraction grid instead of the wrapper-side jnp.dot below.

    h_itemsize = jnp.dtype(h1.dtype).itemsize
    vmem_bytes = (4 * 2 * tile_n * dim * h_itemsize            # 4 h streams, 2 bufs
                  + 2 * 4 * tile_n * 4)                        # (4, tile_n) f32 out
    vmem_bytes += w_bytes if fuse_w else 2 * dim * 2 * 4
    vmem_limit = int(min(64 * (1 << 20), max(16 * (1 << 20), 1.5 * vmem_bytes)))

    h_spec = pl.BlockSpec((tile_n, dim), lambda i: (i, 0))
    smem_spec = pl.BlockSpec(memory_space=pltpu.MemorySpace.SMEM)
    out_spec = pl.BlockSpec((4, tile_n), lambda i: (0, i))
    cparams = pltpu.CompilerParams(dimension_semantics=("parallel",),
                                   vmem_limit_bytes=vmem_limit)

    if fuse_w:
        out = pl.pallas_call(
            _disc_kernel_fused,
            out_shape=jax.ShapeDtypeStruct((4, N), f32),
            grid=grid,
            in_specs=[
                pl.BlockSpec((dim, dim), lambda i: (0, 0)),    # W (grid-invariant)
                pl.BlockSpec((dim, 2), lambda i: (0, 0)),      # C = [c1 | c2]
                smem_spec,                                     # bias scalar
                h_spec, h_spec, h_spec, h_spec,                # h1..h4 row tiles
            ],
            out_specs=out_spec,
            compiler_params=cparams,
        )(W, C, b2, h1, h2, h3, h4)
    else:
        V = jnp.dot(W, C, preferred_element_type=f32).astype(h1.dtype)  # (dim, 2)
        out = pl.pallas_call(
            _disc_kernel_prev,
            out_shape=jax.ShapeDtypeStruct((4, N), f32),
            grid=grid,
            in_specs=[
                pl.BlockSpec((dim, 2), lambda i: (0, 0)),      # V (grid-invariant)
                smem_spec,
                h_spec, h_spec, h_spec, h_spec,
            ],
            out_specs=out_spec,
            compiler_params=cparams,
        )(V, b2, h1, h2, h3, h4)

    # (4, N) rows are (sc_1, sc_2, sc_3, sc_4); row-major flatten == torch.cat.
    return out.reshape(-1)


def _reference(c1, c2, h1, h2, h3, h4, W, bias):
    def bil(h, c):
        return jnp.sum((h @ W) * c.reshape(1, -1), axis=1) + bias
    return jnp.concatenate([bil(h2, c1), bil(h1, c2), bil(h4, c1), bil(h3, c2)])


if __name__ == "__main__":
    key = jax.random.PRNGKey(0)
    N, dim = 512, 128
    ks = jax.random.split(key, 8)

    # Inputs (deterministic).
    c1 = jax.random.normal(ks[0], (dim,), jnp.float32)
    c2 = jax.random.normal(ks[1], (dim,), jnp.float32)
    h1 = jax.random.normal(ks[2], (N, dim), jnp.float32)
    h2 = jax.random.normal(ks[3], (N, dim), jnp.float32)
    h3 = jax.random.normal(ks[4], (N, dim), jnp.float32)
    h4 = jax.random.normal(ks[5], (N, dim), jnp.float32)

    # nn.Bilinear(dim, dim, 1) params, PyTorch-style uniform(-1/sqrt(dim), 1/sqrt(dim)).
    bound = 1.0 / (dim ** 0.5)
    W = jax.random.uniform(ks[6], (dim, dim), jnp.float32, -bound, bound)
    bias = jax.random.uniform(ks[7], (), jnp.float32, -bound, bound)

    logits = discriminator_forward(c1, c2, h1, h2, h3, h4, W, bias)
    jax.block_until_ready(logits)

    ref = _reference(c1, c2, h1, h2, h3, h4, W, bias)
    assert logits.shape == (4 * N,)
    assert jnp.allclose(logits, ref, atol=2e-4, rtol=2e-4), \
        float(jnp.max(jnp.abs(logits - ref)))
    print("KERNEL_OK")
</pallas_src>

<mosaic_0001>
module attributes {stable_mosaic.version = 11 : i64} {
  func.func @_disc_kernel_fused(%arg0: i32, %arg1: memref<128x128xf32, #tpu.memory_space<vmem>>, %arg2: memref<128x2xf32, #tpu.memory_space<vmem>>, %arg3: memref<1x1xf32, #tpu.memory_space<smem>>, %arg4: memref<256x128xf32, #tpu.memory_space<vmem>>, %arg5: memref<256x128xf32, #tpu.memory_space<vmem>>, %arg6: memref<256x128xf32, #tpu.memory_space<vmem>>, %arg7: memref<256x128xf32, #tpu.memory_space<vmem>>, %arg8: memref<4x256xf32, #tpu.memory_space<vmem>>) attributes {dimension_semantics = [#tpu.dimension_semantics<parallel>], iteration_bounds = array<i64: 2>, scalar_prefetch = 0 : i64, scratch_operands = 0 : i64, tpu.core_type = #tpu.core_type<tc>, window_params = [{pipeline_mode = #tpu.pipeline_mode<synchronous>, transform_indices = @transform_0, window_bounds = array<i64: 128, 128>}, {pipeline_mode = #tpu.pipeline_mode<synchronous>, transform_indices = @transform_1, window_bounds = array<i64: 128, 2>}, {transform_indices = @transform_2, window_bounds = array<i64: 1, 1>}, {transform_indices = @transform_3, window_bounds = array<i64: 256, 128>}, {transform_indices = @transform_4, window_bounds = array<i64: 256, 128>}, {transform_indices = @transform_5, window_bounds = array<i64: 256, 128>}, {transform_indices = @transform_6, window_bounds = array<i64: 256, 128>}, {transform_indices = @transform_7, window_bounds = array<i64: 4, 256>}]} {
    %c0 = arith.constant 0 : index
    %c0_0 = arith.constant 0 : index
    %0 = vector.load %arg1[%c0, %c0_0] : memref<128x128xf32, #tpu.memory_space<vmem>>, vector<128x128xf32>
    %c0_1 = arith.constant 0 : index
    %c0_2 = arith.constant 0 : index
    %1 = vector.load %arg2[%c0_1, %c0_2] : memref<128x2xf32, #tpu.memory_space<vmem>>, vector<128x2xf32>
    %cst = arith.constant dense<0.000000e+00> : vector<128x2xf32>
    %2 = tpu.matmul %0, %1, %cst {dimension_numbers = #tpu.dot_dimension_numbers<[1], [0], [0], [1], [0, 0, 1, 1], [], []>} : vector<128x128xf32>, vector<128x2xf32>, vector<128x2xf32> -> vector<128x2xf32>
    %c0_3 = arith.constant 0 : index
    %c0_4 = arith.constant 0 : index
    %3 = memref.load %arg3[%c0_3, %c0_4] : memref<1x1xf32, #tpu.memory_space<smem>>
    %4 = vector.extract_strided_slice %2 {offsets = [0, 0], sizes = [128, 1], strides = [1, 1]} : vector<128x2xf32> to vector<128x1xf32>
    %5 = vector.extract_strided_slice %2 {offsets = [0, 1], sizes = [128, 1], strides = [1, 1]} : vector<128x2xf32> to vector<128x1xf32>
    %c0_5 = arith.constant 0 : index
    %c0_6 = arith.constant 0 : index
    %6 = vector.load %arg5[%c0_5, %c0_6] : memref<256x128xf32, #tpu.memory_space<vmem>>, vector<256x128xf32>
    %cst_7 = arith.constant dense<0.000000e+00> : vector<256x1xf32>
    %7 = tpu.matmul %6, %4, %cst_7 {dimension_numbers = #tpu.dot_dimension_numbers<[1], [0], [0], [1], [0, 0, 1, 1], [], []>} : vector<256x128xf32>, vector<128x1xf32>, vector<256x1xf32> -> vector<256x1xf32>
    %c0_8 = arith.constant 0 : index
    %c0_9 = arith.constant 0 : index
    %8 = vector.load %arg4[%c0_8, %c0_9] : memref<256x128xf32, #tpu.memory_space<vmem>>, vector<256x128xf32>
    %cst_10 = arith.constant dense<0.000000e+00> : vector<256x1xf32>
    %9 = tpu.matmul %8, %5, %cst_10 {dimension_numbers = #tpu.dot_dimension_numbers<[1], [0], [0], [1], [0, 0, 1, 1], [], []>} : vector<256x128xf32>, vector<128x1xf32>, vector<256x1xf32> -> vector<256x1xf32>
    %c0_11 = arith.constant 0 : index
    %c0_12 = arith.constant 0 : index
    %10 = vector.load %arg7[%c0_11, %c0_12] : memref<256x128xf32, #tpu.memory_space<vmem>>, vector<256x128xf32>
    %cst_13 = arith.constant dense<0.000000e+00> : vector<256x1xf32>
    %11 = tpu.matmul %10, %4, %cst_13 {dimension_numbers = #tpu.dot_dimension_numbers<[1], [0], [0], [1], [0, 0, 1, 1], [], []>} : vector<256x128xf32>, vector<128x1xf32>, vector<256x1xf32> -> vector<256x1xf32>
    %c0_14 = arith.constant 0 : index
    %c0_15 = arith.constant 0 : index
    %12 = vector.load %arg6[%c0_14, %c0_15] : memref<256x128xf32, #tpu.memory_space<vmem>>, vector<256x128xf32>
    %cst_16 = arith.constant dense<0.000000e+00> : vector<256x1xf32>
    %13 = tpu.matmul %12, %5, %cst_16 {dimension_numbers = #tpu.dot_dimension_numbers<[1], [0], [0], [1], [0, 0, 1, 1], [], []>} : vector<256x128xf32>, vector<128x1xf32>, vector<256x1xf32> -> vector<256x1xf32>
    %14 = tpu.concatenate %7, %9, %11, %13 in 1 : vector<256x1xf32>, vector<256x1xf32>, vector<256x1xf32>, vector<256x1xf32> -> vector<256x4xf32>
    %15 = vector.broadcast %3 : f32 to vector<256x4xf32>
    %16 = arith.addf %14, %15 : vector<256x4xf32>
    %17 = tpu.transpose %16, [1, 0] : vector<256x4xf32> -> vector<4x256xf32>
    %c0_17 = arith.constant 0 : index
    %c0_18 = arith.constant 0 : index
    %18 = vector.load %arg8[%c0_17, %c0_18] : memref<4x256xf32, #tpu.memory_space<vmem>>, vector<4x256xf32>
    tpu.vector_store %arg8[%c0_17, %c0_18], %17 {strides = array<i32>} : memref<4x256xf32, #tpu.memory_space<vmem>>, vector<4x256xf32>,
    return
  }
  func.func @transform_0(%arg0: i32) -> (i32, i32) {
    %c0_i32 = arith.constant 0 : i32
    %c0_i32_0 = arith.constant 0 : i32
    %c0_i32_1 = arith.constant 0 : i32
    return %c0_i32, %c0_i32_0 : i32, i32
  }
  func.func @transform_1(%arg0: i32) -> (i32, i32) {
    %c0_i32 = arith.constant 0 : i32
    %c0_i32_0 = arith.constant 0 : i32
    %c0_i32_1 = arith.constant 0 : i32
    return %c0_i32, %c0_i32_0 : i32, i32
  }
  func.func @transform_2(%arg0: i32) -> (i32, i32) {
    %c0_i32 = arith.constant 0 : i32
    %c0_i32_0 = arith.constant 0 : i32
    %c0_i32_1 = arith.constant 0 : i32
    return %c0_i32, %c0_i32_0 : i32, i32
  }
  func.func @transform_3(%arg0: i32) -> (i32, i32) {
    %c0_i32 = arith.constant 0 : i32
    %c0_i32_0 = arith.constant 0 : i32
    return %arg0, %c0_i32 : i32, i32
  }
  func.func @transform_4(%arg0: i32) -> (i32, i32) {
    %c0_i32 = arith.constant 0 : i32
    %c0_i32_0 = arith.constant 0 : i32
    return %arg0, %c0_i32 : i32, i32
  }
  func.func @transform_5(%arg0: i32) -> (i32, i32) {
    %c0_i32 = arith.constant 0 : i32
    %c0_i32_0 = arith.constant 0 : i32
    return %arg0, %c0_i32 : i32, i32
  }
  func.func @transform_6(%arg0: i32) -> (i32, i32) {
    %c0_i32 = arith.constant 0 : i32
    %c0_i32_0 = arith.constant 0 : i32
    return %arg0, %c0_i32 : i32, i32
  }
  func.func @transform_7(%arg0: i32) -> (i32, i32) {
    %c0_i32 = arith.constant 0 : i32
    %c0_i32_0 = arith.constant 0 : i32
    return %c0_i32, %arg0 : i32, i32
  }
}

</mosaic_0001>

<bundles_post_ra>
// kernel: tpu_custom_call.1
= control target key start
LH: loop header
LB: loop body
LE: loop exit
PB: predicated region body
PF: predicated region fallthrough
CT: control target
= control target key end

     0   :  { %s4738_s0 = inlined_call_operand.vmem [shape: f32[128,128], index: 0, kind: input, shape index: {}]   ;;  %s4739_s1 = inlined_call_operand.vmem [shape: f32[128,2], index: 1, kind: input, shape index: {}]   ;;  %s4740_s2 = inlined_call_operand.<no memory space> [shape: f32[1,1], index: 2, kind: input, shape index: {}]   ;;  %s4741_s3 = inlined_call_operand.hbm [shape: f32[512,128], index: 3, kind: input, shape index: {}]   ;;  %s4742_s4 = inlined_call_operand.hbm [shape: f32[512,128], index: 4, kind: input, shape index: {}]   ;;  %s4743_s5 = inlined_call_operand.hbm [shape: f32[512,128], index: 5, kind: input, shape index: {}]   ;;  %s4744_s6 = inlined_call_operand.hbm [shape: f32[512,128], index: 6, kind: input, shape index: {}]   ;;  %s4745_s7 = inlined_call_operand.hbm [shape: f32[4,512], index: 7, kind: output, shape index: {}]  }
   0x1   :  { %4755 = sst [smem:[#allocation32_spill]] %s4741_s3 }
   0x2   :  { %4756 = sst [smem:[#allocation33_spill]] %s4742_s4 }
   0x3   :  { %12 = sst [smem:[#allocation2]] %s4740_s2 }
   0x4   :  { %13 = vsyncpa [#allocation4], 0 }
   0x5   :  { %15 = vsyncpa [#allocation4 + $0x1], 0 }
   0x6   :  { %16 = vsyncpa [#allocation7], 0 }
   0x7   :  { %18 = vsyncpa [#allocation7 + $0x1], 0 }
   0x8   :  { %19 = vsyncpa [#allocation10], 0 }
   0x9   :  { %21 = vsyncpa [#allocation10 + $0x1], 0 }
   0xa   :  { %22 = vsyncpa [#allocation5], 0 }
   0xb   :  { %24 = vsyncpa [#allocation5 + $0x1], 0  ;;  %s3590_s26 = smov 0   ;;  %s3592_s27 = smov 0  }
   0xc   :  { %s3594_s28 = smov 0   ;;  %s3596_s29 = smov 0  }
   0xd LB: > { %4757 = sst [smem:[#allocation16_spill]] %s3530_s28  ;;  %s3611_s2 = sadd.s32 4294967295, %s3534_s29   ;;  %s3534_s29 = sphi %s3596_s29, %s4802_s29   ;;  %s3530_s28 = sphi %s3594_s28, %s4804_s28   ;;  %s3526_s27 = sphi %s3592_s27, %s4806_s27   ;;  %s3522_s26 = sphi %s3590_s26, %s4805_s26  }
   0xe   : > { %s2426_s30 = sadd.s32 4294967294, %s3534_s29   ;;  %s3615_s8 = sadd.s32 1, %s3534_s29  }
   0xf   : > { %4758 = sst [smem:[#allocation17_spill]] %s3615_s8  ;;  %s100_s9 = sadd.s32 1, %s3530_s28 }
  0x10   : > { %s97_s10 = ssub.s32 %s3534_s29, %s3615_s8  ;;  %p107_p0 = scmp.ne.s32.totalorder %s3530_s28, %s3526_s27 }
  0x11   : > { %p98_p1 = scmp.eq.s32.totalorder %s97_s10, 0  ;;  %p108_p2 = scmp.eq.s32.totalorder %s3534_s29, 0 }
  0x12   : > { %p113_p3 = scmp.ne.s32.totalorder %s3526_s27, %s3522_s26  ;;  %p114_p4 = scmp.eq.s32.totalorder %s3611_s2, 0 }
  0x13   : > { %s3627_s11 = scalar_select %p98_p1, %s3530_s28, %s100_s9  }
  0x14   : > { %p109_p5 = por %p108_p2, %p107_p0  ;;  %p3629_p6 = por %p114_p4, %p113_p3 }
  0x15   : > { %4759 = sst [smem:[#allocation18_spill]] %s3627_s11  ;;  %p215_p7 = scmp.eq.s32.totalorder %s3611_s2, 1 }
  0x16   : > { %s4760_s12 = scalar_select %p3629_p6, 1, 0 }
  0x17   : > { %p221_p8 = scmp.eq.s32.totalorder %s2426_s30, 1  ;;  %p3260_p10 = scmp.lt.s32.totalorder %s3534_s29, 2 }
  0x18   : > { %p3636_p11 = por %p215_p7, %p107_p0  ;;  %s3645_s15 = sand.u32 1, %s3530_s28  }
  0x19   : > { %p3640_p12 = por %p221_p8, %p113_p3  ;;  %s3648_s16 = sshll.u32 %s3534_s29, 12 }
  0x1a   : > { %s4761_s13 = scalar_select %p3636_p11, 1, 0 }
  0x1b   : > { %s4762_s14 = scalar_select %p3640_p12, 1, 0 }
  0x1c   : > { %s3651_s17 = sshll.u32 %s3645_s15, 8  ;;  %p3653_p13 = pnand %p3260_p10, %p109_p5 }
  0x1d   : > { %s271_s19 = sand.u32 1, %s3534_s29   ;;  %s4764_s4 = sld [smem:[#allocation33_spill]] }
  0x1e   : > { %s275_s23 = scalar_lea.vmem [#allocation6], %s3651_s17  ;;  %s3668_s25 = scalar_lea.sflag [#allocation7], %s271_s19 }
  0x1f   : > { %s282_s24 = sshll.u32 %s275_s23, 4  ;;  %p3674_p2 = pneg %p3653_p13  ;;  %s3665_s24 = int_to_ptr.vmem [resolvable:$true] %s282_s24 }
  0x23   : > { %s3662_s22 = scalar_lea.hbm %s4764_s4, %s3648_s16  ;;  %s3345_s21 = scalar_lea.hbm %s4764_s4, 8192 }
  0x24   : > { %s3340_s30 = scalar_lea.hbm %s3662_s22, 4096  ;;  %p3346_p5 = scmp.lt.u32.totalorder %s3662_s22, %s4764_s4 }
  0x25   : > { %p3341_p1 = scmp.ne.s32.totalorder %s3662_s22, %s3340_s30  ;;  %p3347_p7 = scmp.lt.u32.totalorder %s3345_s21, %s3340_s30 }
  0x26   : > { %p3349_p10 = scmp.lt.u32.totalorder %s3340_s30, %s3662_s22 }
  0x27   : > { %p3343_p3 = pnand %p3674_p2, %p3341_p1  ;;  %p3348_p8 = por %p3347_p7, %p3346_p5 }
  0x29   : > { %p3344_p4 = pneg %p3343_p3  ;;  %p3350_p9 = por %p3349_p10, %p3348_p8 }
  0x2b   : > { %p3351_p0 = pnand %p3350_p9, %p3344_p4 }
  0x2d   : > { %3354 = shalt.err (!%p3351_p0)
}
  0x2e   : > { %s3355_s19 = scalar_lea.vmem %s3665_s24, 4096  ;;  %s3536_s10 = smov [#allocation6]  }
  0x2f   : > { %p3356_p1 = scmp.ne.s32.totalorder %s3665_s24, %s3355_s19  ;;  %s3360_s20 = sshll.u32 %s3536_s10, 4  ;;  %s3361_s20 = int_to_ptr.vmem [resolvable:$false] %s3360_s20 }
  0x30   : > { %s3362_s11 = scalar_lea.vmem %s3361_s20, 8192  ;;  %p3363_p11 = scmp.lt.s32.totalorder %s3665_s24, %s3361_s20 }
  0x31   : > { %p3358_p3 = pnand %p3356_p1, %p3674_p2  ;;  %p3364_p6 = scmp.lt.s32.totalorder %s3362_s11, %s3355_s19 }
  0x33   : > { %p3359_p12 = pneg %p3358_p3  ;;  %p3365_p5 = por %p3364_p6, %p3363_p11 }
  0x35   : > { %p3366_p7 = pnand %p3365_p5, %p3359_p12 }
  0x37   : > { %3369 = shalt.err (!%p3366_p7)
}
  0x38   : > { %s4748_s30 = smov 128   ;;  %s4750_s21 = smov 8  }
  0x39   : > { %3249 = dma.hbm_to_vmem [thread:$0]  (!%p3653_p13), %s3662_s22, 4096, %s3665_s24, %s3668_s25, %s4748_s30, %s4748_s30, %s4750_s21  }
  0x3a   : > { %p332_p6 = scmp.lt.s32.totalorder %s3534_s29, 3  ;;  %s4766_s3 = sld [smem:[#allocation32_spill]] }
  0x3b   : > { %p4767_p9 = scmp.ge.s32.totalorder %s3534_s29, 1  ;;  %s254_s11 = scalar_lea.vmem [#allocation3], %s3651_s17 }
  0x3c   : > { %s261_s4 = sshll.u32 %s254_s11, 4  ;;  %s251_s22 = scalar_lea.sflag [#allocation4], %s3645_s15  ;;  %s3715_s4 = int_to_ptr.vmem [resolvable:$true] %s261_s4 }
  0x3d   : > { %p3710_p11 = pnand %p4767_p9, %p332_p6 }
  0x3f   : > { %s4768_s20 = scalar_select %p3710_p11, 1, 0 }
  0x40   : > { %s3706_s10 = scalar_lea.hbm %s4766_s3, %s3648_s16  ;;  %s3375_s30 = scalar_lea.hbm %s4766_s3, 8192 }
  0x41   : > { %s3370_s24 = scalar_lea.hbm %s3706_s10, 4096  ;;  %p3376_p8 = scmp.lt.u32.totalorder %s3706_s10, %s4766_s3 }
  0x42   : > { %p3371_p12 = scmp.ne.s32.totalorder %s3706_s10, %s3370_s24  ;;  %p3377_p10 = scmp.lt.u32.totalorder %s3375_s30, %s3370_s24 }
  0x43   : > { %p3379_p3 = scmp.lt.u32.totalorder %s3370_s24, %s3706_s10 }
  0x44   : > { %p3373_p0 = pnand %p3371_p12, %p3674_p2  ;;  %p3378_p1 = por %p3377_p10, %p3376_p8 }
  0x46   : > { %p3374_p4 = pneg %p3373_p0  ;;  %p3380_p5 = por %p3379_p3, %p3378_p1 }
  0x48   : > { %p3381_p7 = pnand %p3380_p5, %p3374_p4 }
  0x4a   : > { %3384 = shalt.err (!%p3381_p7)
}
  0x4b   : > { %s3385_s11 = scalar_lea.vmem %s3715_s4, 4096  ;;  %s3539_s23 = smov [#allocation3]  }
  0x4c   : > { %p3386_p6 = scmp.ne.s32.totalorder %s3715_s4, %s3385_s11  ;;  %s3390_s19 = sshll.u32 %s3539_s23, 4  ;;  %s3391_s19 = int_to_ptr.vmem [resolvable:$false] %s3390_s19 }
  0x4d   : > { %s3392_s28 = scalar_lea.vmem %s3391_s19, 8192  ;;  %p3393_p0 = scmp.lt.s32.totalorder %s3715_s4, %s3391_s19 }
  0x4e   : > { %p3388_p9 = pnand %p3386_p6, %p3674_p2  ;;  %p3394_p11 = scmp.lt.s32.totalorder %s3392_s28, %s3385_s11 }
  0x50   : > { %p3389_p12 = pneg %p3388_p9  ;;  %p3395_p8 = por %p3394_p11, %p3393_p0 }
  0x52   : > { %p3396_p10 = pnand %p3395_p8, %p3389_p12 }
  0x54   : > { %3399 = shalt.err (!%p3396_p10)
}
  0x55   : > { %s4769_s30 = smov 8   ;;  %s4770_s21 = smov 128  }
  0x56   : > { %3246 = dma.hbm_to_vmem [thread:$0]  (!%p3653_p13), %s3706_s10, 4096, %s3715_s4, %s251_s22, %s4770_s21, %s4770_s21, %s4769_s30  }
  0x57   : > { %s3748_s11 = scalar_lea.hbm %s4743_s5, %s3648_s16  ;;  %s296_s19 = scalar_lea.vmem [#allocation8], %s3651_s17 }
  0x58   : > { %s303_s28 = sshll.u32 %s296_s19, 4  ;;  %s3400_s3 = scalar_lea.hbm %s3748_s11, 4096  ;;  %s3751_s28 = int_to_ptr.vmem [resolvable:$true] %s303_s28 }
  0x59   : > { %p3401_p11 = scmp.ne.s32.totalorder %s3748_s11, %s3400_s3  ;;  %s3405_s10 = scalar_lea.hbm %s4743_s5, 8192 }
  0x5a   : > { %p3406_p3 = scmp.lt.u32.totalorder %s3748_s11, %s4743_s5  ;;  %p3407_p5 = scmp.lt.u32.totalorder %s3405_s10, %s3400_s3 }
  0x5b   : > { %p3403_p4 = pnand %p3401_p11, %p3674_p2  ;;  %p3409_p6 = scmp.lt.u32.totalorder %s3400_s3, %s3748_s11 }
  0x5c   : > { %p3408_p7 = por %p3407_p5, %p3406_p3 }
  0x5d   : > { %p3404_p1 = pneg %p3403_p4 }
  0x5e   : > { %p3410_p9 = por %p3409_p6, %p3408_p7 }
  0x60   : > { %p3411_p12 = pnand %p3410_p9, %p3404_p1 }
  0x62   : > { %3414 = shalt.err (!%p3411_p12)
}
  0x63   : > { %s3415_s23 = scalar_lea.vmem %s3751_s28, 4096  ;;  %s3540_s8 = smov [#allocation8]  }
  0x64   : > { %p3416_p0 = scmp.ne.s32.totalorder %s3751_s28, %s3415_s23  ;;  %s3420_s19 = sshll.u32 %s3540_s8, 4  ;;  %s3421_s19 = int_to_ptr.vmem [resolvable:$false] %s3420_s19 }
  0x65   : > { %s3422_s4 = scalar_lea.vmem %s3421_s19, 8192  ;;  %p3423_p11 = scmp.lt.s32.totalorder %s3751_s28, %s3421_s19 }
  0x66   : > { %p3418_p8 = pnand %p3416_p0, %p3674_p2  ;;  %p3424_p4 = scmp.lt.s32.totalorder %s3422_s4, %s3415_s23 }
  0x68   : > { %p3419_p10 = pneg %p3418_p8  ;;  %p3425_p3 = por %p3424_p4, %p3423_p11 }
  0x6a   : > { %p3426_p5 = pnand %p3425_p3, %p3419_p10 }
  0x6c   : > { %3429 = shalt.err (!%p3426_p5)
}
  0x6d   : > { %3252 = dma.hbm_to_vmem [thread:$0]  (!%p3653_p13), %s3748_s11, 4096, %s3751_s28, %s3668_s25, %s4770_s21, %s4770_s21, %s4769_s30  }
  0x6e   : > { %s3782_s22 = scalar_lea.hbm %s4744_s6, %s3648_s16  ;;  %s317_s24 = scalar_lea.vmem [#allocation9], %s3651_s17 }
  0x6f   : > { %s324_s23 = sshll.u32 %s317_s24, 4  ;;  %s314_s8 = scalar_lea.sflag [#allocation10], %s3645_s15  ;;  %s3785_s23 = int_to_ptr.vmem [resolvable:$true] %s324_s23 }
  0x70   : > { %s3430_s19 = scalar_lea.hbm %s3782_s22, 4096  ;;  %s3435_s28 = scalar_lea.hbm %s4744_s6, 8192 }
  0x71   : > { %p3431_p1 = scmp.ne.s32.totalorder %s3782_s22, %s3430_s19  ;;  %p3436_p9 = scmp.lt.u32.totalorder %s3782_s22, %s4744_s6 }
  0x72   : > { %p3437_p12 = scmp.lt.u32.totalorder %s3435_s28, %s3430_s19  ;;  %p3439_p8 = scmp.lt.u32.totalorder %s3430_s19, %s3782_s22 }
  0x73   : > { %p3433_p7 = pnand %p3431_p1, %p3674_p2 }
  0x74   : > { %p3438_p0 = por %p3437_p12, %p3436_p9 }
  0x75   : > { %p3434_p6 = pneg %p3433_p7 }
  0x76   : > { %p3440_p10 = por %p3439_p8, %p3438_p0 }
  0x78   : > { %p3441_p11 = pnand %p3440_p10, %p3434_p6 }
  0x7a   : > { %3444 = shalt.err (!%p3441_p11)
}
  0x7b   : > { %s3445_s17 = scalar_lea.vmem %s3785_s23, 4096  ;;  %s3541_s3 = smov [#allocation9]  }
  0x7c   : > { %p3446_p4 = scmp.ne.s32.totalorder %s3785_s23, %s3445_s17  ;;  %s3450_s10 = sshll.u32 %s3541_s3, 4  ;;  %s3451_s10 = int_to_ptr.vmem [resolvable:$false] %s3450_s10 }
  0x7d   : > { %s3452_s24 = scalar_lea.vmem %s3451_s10, 8192  ;;  %p3453_p1 = scmp.lt.s32.totalorder %s3785_s23, %s3451_s10 }
  0x7e   : > { %p3448_p3 = pnand %p3446_p4, %p3674_p2  ;;  %p3454_p7 = scmp.lt.s32.totalorder %s3452_s24, %s3445_s17 }
  0x80   : > { %p3449_p5 = pneg %p3448_p3  ;;  %p3455_p9 = por %p3454_p7, %p3453_p1 }
  0x82   : > { %p3456_p12 = pnand %p3455_p9, %p3449_p5 }
  0x84   : > { %3459 = shalt.err (!%p3456_p12)
}
  0x85   : > { %3255 = dma.hbm_to_vmem [thread:$0]  (!%p3653_p13), %s3782_s22, 4096, %s3785_s23, %s314_s8, %s4770_s21, %s4770_s21, %s4769_s30  }
  0x86   : > { %p4771_p2 = scmp.ne.s32.totalorder %s4768_s20, 0 }
  0x88   : > { %336 = sbr.rel (%p4771_p2) target bundleno = 1158 (0x486), region = 48 }
  0x8f   : > { %s3817_s9 = sand.u32 1, %s3526_s27   ;;  %p4772_p6 = scmp.ne.s32.totalorder %s4760_s12, 0 }
  0x90   : > { %s2442_s19 = sshll.u32 %s3817_s9, 8  ;;  %s339_s25 = scalar_lea.sflag [#allocation4], %s3817_s9 }
  0x91   : > { %s3821_s18 = scalar_lea.vmem [#allocation3], %s2442_s19 }
  0x92   : > { %3505 = dma.done.wait (%p4772_p6), %s339_s25, 4096  }
  0x93   : > { %3507 = vsyncadd (%p4772_p6), %s339_s25, 4294963200  ;;  %s347_s15 = sand.u32 1, %s3611_s2   ;;  %s3828_s30 = scalar_lea.vmem [#allocation6], %s2442_s19 }
  0x94   : > { %s348_s20 = scalar_lea.sflag [#allocation7], %s347_s15 }
  0x95   : > { %3509 = dma.done.wait (%p4772_p6), %s348_s20, 8192  }
  0x96   : > { %3511 = vsyncadd (%p4772_p6), %s348_s20, 4294959104  ;;  %s3834_s21 = scalar_lea.vmem [#allocation8], %s2442_s19  ;;  %s366_s22 = scalar_lea.sflag [#allocation10], %s3817_s9 }
  0x97   : > { %s3837_s23 = scalar_lea.vmem [#allocation9], %s2442_s19 }
  0x98   : > { %3513 = dma.done.wait (%p4772_p6), %s366_s22, 4096  }
  0x99   : > { %3515 = vsyncadd (%p4772_p6), %s366_s22, 4294963200  ;;  %v436_v0 = vld [vmem:[%s4739_s1] sm:$0xff]  ;;  %v437_v1 = vld [vmem:[%s4739_s1 + $0x8] sm:$0xff]  ;;  %s3542_s4 = smov 127   ;;  %vm2074_vm0 = vcmask 7168   ;;  %vm2107_vm1 = vcmask 15360  }
  0x9a   : > { %v438_v2 = vld [vmem:[%s4739_s1 + $0x10] sm:$0xff]  ;;  %v3057_v3 = vpack.c.bf16 %v437_v1, %v436_v0  ;;  %v439_v4 = vld [vmem:[%s4739_s1 + $0x18] sm:$0xff]  ;;  %v440_v6 = vld [vmem:[%s4739_s1 + $0x20] sm:$0xff]  ;;  %vm2140_vm2 = vcmask 23552   ;;  %s2446_s17 = sshll.u32 %s3817_s9, 3  ;;  %s2456_s3 = sshll.u32 %s3611_s2, 7 }
  0x9b   : > { %v3061_v5 = vpack.c.bf16 %v439_v4, %v438_v2  ;;  %v441_v7 = vld [vmem:[%s4739_s1 + $0x28] sm:$0xff]  ;;  %v420_v9 = vld [vmem:[%s4738_s0] sm:$0xff]  ;;  %v442_v10 = vld [vmem:[%s4739_s1 + $0x30] sm:$0xff]  ;;  %s414_s10 = scalar_lea.vmem [#allocation11], %s2446_s17  ;;  %s4694_s25 = scalar_lea.hbm %s4745_s7, %s2456_s3 }
  0x9c   : > { %3058 = vmatprep.subr.bf16.mxu0 %v3057_v3  ;;  %v3065_v8 = vpack.c.bf16 %v441_v7, %v440_v6  ;;  %v443_v11 = vld [vmem:[%s4739_s1 + $0x38] sm:$0xff]  ;;  %2713 = vmatprep.mubr.f32.mxu0 %v420_v9  ;;  %v444_v13 = vld [vmem:[%s4739_s1 + $0x40] sm:$0xff]  ;;  %v445_v14 = vld [vmem:[%s4739_s1 + $0x48] sm:$0xff]  ;;  %s2290_s12 = sshll.u32 %s414_s10, 4  ;;  %s2276_s15 = scalar_lea.sflag [#allocation5], %s3817_s9  ;;  %s4696_s12 = int_to_ptr.vmem [resolvable:$true] %s2290_s12 }
  0x9d   : > { %3060 = vmatpush3.bf16.msra.mxu0 %v3057_v3  ;;  %v3069_v12 = vpack.c.bf16 %v443_v11, %v442_v10  ;;  %v3073_v15 = vpack.c.bf16 %v445_v14, %v444_v13  ;;  %v446_v16 = vld [vmem:[%s4739_s1 + $0x50] sm:$0xff]  ;;  %v447_v17 = vld [vmem:[%s4739_s1 + $0x58] sm:$0xff]  ;;  %v448_v19 = vld [vmem:[%s4739_s1 + $0x60] sm:$0xff]  ;;  %s3460_s20 = scalar_lea.vmem %s4696_s12, 128  ;;  %p4799_p0 = scmp.ne.s32.totalorder %s4761_s13, 0 }
  0x9e   : > { %3062 = vmatprep.subr.bf16.mxu0 %v3061_v5  ;;  %v3077_v18 = vpack.c.bf16 %v447_v17, %v446_v16  ;;  %v449_v20 = vld [vmem:[%s4739_s1 + $0x68] sm:$0xff]  ;;  %v450_v22 = vld [vmem:[%s4739_s1 + $0x70] sm:$0xff]  ;;  %v451_v23 = vld [vmem:[%s4739_s1 + $0x78] sm:$0xff]  ;;  %p3461_p13 = scmp.ne.s32.totalorder %s4696_s12, %s3460_s20  ;;  %s3546_s2 = smov [#allocation11]  }
  0x9f   : > { %v3081_v21 = vpack.c.bf16 %v449_v20, %v448_v19  ;;  %v3085_v24 = vpack.c.bf16 %v451_v23, %v450_v22  ;;  %v421_v25 = vld [vmem:[%s4738_s0 + $0x8] sm:$0xff]  ;;  %v422_v26 = vld [vmem:[%s4738_s0 + $0x10] sm:$0xff]  ;;  %v423_v27 = vld [vmem:[%s4738_s0 + $0x18] sm:$0xff]  ;;  %s3464_s22 = sshll.u32 %s3546_s2, 4  ;;  %s3465_s22 = int_to_ptr.vmem [resolvable:$false] %s3464_s22 }
  0xa0   : > { %v424_v28 = vld [vmem:[%s4738_s0 + $0x20] sm:$0xff]  ;;  %v425_v29 = vld [vmem:[%s4738_s0 + $0x28] sm:$0xff]  ;;  %v426_v30 = vld [vmem:[%s4738_s0 + $0x30] sm:$0xff]  ;;  %p3462_p8 = pnand %p3461_p13, %p4799_p0  ;;  %s3466_s8 = scalar_lea.vmem %s3465_s22, 256 }
  0xa1   : > { %3064 = vmatpush3.bf16.msra.mxu0 %v3061_v5  ;;  %v427_v31 = vld [vmem:[%s4738_s0 + $0x38] sm:$0xff]  ;;  %v428_v32 = vld [vmem:[%s4738_s0 + $0x40] sm:$0xff]  ;;  %v429_v33 = vld [vmem:[%s4738_s0 + $0x48] sm:$0xff]  ;;  %p3467_p11 = scmp.lt.s32.totalorder %s4696_s12, %s3465_s22  ;;  %p3468_p4 = scmp.lt.s32.totalorder %s3466_s8, %s3460_s20 }
  0xa2   : > { %3066 = vmatprep.subr.bf16.mxu0 %v3065_v8  ;;  %v430_v34 = vld [vmem:[%s4738_s0 + $0x50] sm:$0xff]  ;;  %v431_v35 = vld [vmem:[%s4738_s0 + $0x58] sm:$0xff]  ;;  %v432_v36 = vld [vmem:[%s4738_s0 + $0x60] sm:$0xff]  ;;  %p3463_p10 = pneg %p3462_p8 }
  0xa3   : > { %v433_v37 = vld [vmem:[%s4738_s0 + $0x68] sm:$0xff]  ;;  %v434_v38 = vld [vmem:[%s4738_s0 + $0x70] sm:$0xff]  ;;  %v435_v39 = vld [vmem:[%s4738_s0 + $0x78] sm:$0xff]  ;;  %p3469_p3 = por %p3468_p4, %p3467_p11 }
  0xa4   : > { %v598_v40 = vld [vmem:[%s3828_s30] sm:$0xff]  ;;  %v599_v10 = vld [vmem:[%s3828_s30 + $0x8] sm:$0xff]  ;;  %v600_v11 = vld [vmem:[%s3828_s30 + $0x10] sm:$0xff] }
  0xa5   : > { %3068 = vmatpush3.bf16.msra.mxu0 %v3065_v8  ;;  %2769 = vmatprep.mubr.f32.mxu1 %v598_v40  ;;  %v855_v3 = vld [vmem:[%s3821_s18] sm:$0xff]  ;;  %v603_v14 = vld [vmem:[%s3828_s30 + $0x28] sm:$0xff]  ;;  %v605_v16 = vld [vmem:[%s3828_s30 + $0x38] sm:$0xff]  ;;  %p3470_p5 = pnand %p3469_p3, %p3463_p10 }
  0xa6   : > { %3070 = vmatprep.subr.bf16.mxu0 %v3069_v12  ;;  %v602_v13 = vld [vmem:[%s3828_s30 + $0x20] sm:$0xff]  ;;  %v608_v19 = vld [vmem:[%s3828_s30 + $0x50] sm:$0xff]  ;;  %v609_v20 = vld [vmem:[%s3828_s30 + $0x58] sm:$0xff] }
  0xa7   : > { %v606_v17 = vld [vmem:[%s3828_s30 + $0x40] sm:$0xff]  ;;  %v611_v22 = vld [vmem:[%s3828_s30 + $0x68] sm:$0xff]  ;;  %v612_v23 = vld [vmem:[%s3828_s30 + $0x70] sm:$0xff] }
  0xa8   : > { %v629_v40 = vld [vmem:[%s3828_s30 + $0xf8] sm:$0xff] }
  0xa9   : > { %3072 = vmatpush3.bf16.msra.mxu0 %v3069_v12  ;;  %v601_v12 = vld [vmem:[%s3828_s30 + $0x18] sm:$0xff] }
  0xaa   : > { %3074 = vmatprep.subr.bf16.mxu0 %v3073_v15 }
  0xad   : > { %3076 = vmatpush3.bf16.msra.mxu0 %v3073_v15  ;;  %v604_v15 = vld [vmem:[%s3828_s30 + $0x30] sm:$0xff] }
  0xae   : > { %3078 = vmatprep.subr.bf16.mxu0 %v3077_v18 }
  0xb1   : > { %3080 = vmatpush3.bf16.msra.mxu0 %v3077_v18  ;;  %v607_v18 = vld [vmem:[%s3828_s30 + $0x48] sm:$0xff] }
  0xb2   : > { %3082 = vmatprep.subr.bf16.mxu0 %v3081_v21 }
  0xb5   : > { %3084 = vmatpush3.bf16.msra.mxu0 %v3081_v21  ;;  %v610_v21 = vld [vmem:[%s3828_s30 + $0x60] sm:$0xff] }
  0xb6   : > { %3086 = vmatprep.subr.bf16.mxu0 %v3085_v24 }
  0xb9   : > { %3088 = vmatpush3.bf16.msra.mxu0 %v3085_v24  ;;  %v613_v24 = vld [vmem:[%s3828_s30 + $0x78] sm:$0xff] }
  0xbc   : > { %2714 = vmatmul.mubr.f32.vlgmr.msra.gmra.mrb[0].mxu0 %v421_v25  ;;  %v614_v25 = vld [vmem:[%s3828_s30 + $0x80] sm:$0xff] }
  0xbd   : > { %2716 = vmatprep.mubr.f32.mxu0 %v422_v26  ;;  %v615_v26 = vld [vmem:[%s3828_s30 + $0x88] sm:$0xff] }
  0xc0   : > { %2717 = vmatmul.mubr.f32.gmra.mrb[2].mxu0 %v423_v27  ;;  %v616_v27 = vld [vmem:[%s3828_s30 + $0x90] sm:$0xff] }
  0xc1   : > { %2719 = vmatprep.mubr.f32.mxu0 %v424_v28  ;;  %v617_v28 = vld [vmem:[%s3828_s30 + $0x98] sm:$0xff] }
  0xc4   : > { %2720 = vmatmul.mubr.f32.gmra.mrb[4].mxu0 %v425_v29  ;;  %v618_v29 = vld [vmem:[%s3828_s30 + $0xa0] sm:$0xff] }
  0xc5   : > { %2722 = vmatprep.mubr.f32.mxu0 %v426_v30  ;;  %v619_v30 = vld [vmem:[%s3828_s30 + $0xa8] sm:$0xff] }
  0xc8   : > { %2723 = vmatmul.mubr.f32.gmra.mrb[6].mxu0 %v427_v31  ;;  %v620_v31 = vld [vmem:[%s3828_s30 + $0xb0] sm:$0xff] }
  0xc9   : > { %2725 = vmatprep.mubr.f32.mxu0 %v428_v32  ;;  %v621_v32 = vld [vmem:[%s3828_s30 + $0xb8] sm:$0xff] }
  0xcc   : > { %2726 = vmatmul.mubr.f32.gmra.mrb[8].mxu0 %v429_v33  ;;  %v622_v33 = vld [vmem:[%s3828_s30 + $0xc0] sm:$0xff] }
  0xcd   : > { %2728 = vmatprep.mubr.f32.mxu0 %v430_v34  ;;  %v623_v34 = vld [vmem:[%s3828_s30 + $0xc8] sm:$0xff] }
  0xd0   : > { %2729 = vmatmul.mubr.f32.gmra.mrb[10].mxu0 %v431_v35  ;;  %v624_v35 = vld [vmem:[%s3828_s30 + $0xd0] sm:$0xff] }
  0xd1   : > { %2731 = vmatprep.mubr.f32.mxu0 %v432_v36  ;;  %v625_v36 = vld [vmem:[%s3828_s30 + $0xd8] sm:$0xff] }
  0xd4   : > { %2732 = vmatmul.mubr.f32.gmra.mrb[12].mxu0 %v433_v37  ;;  %v626_v37 = vld [vmem:[%s3828_s30 + $0xe0] sm:$0xff] }
  0xd5   : > { %2734 = vmatprep.mubr.f32.mxu0 %v434_v38  ;;  %v627_v38 = vld [vmem:[%s3828_s30 + $0xe8] sm:$0xff] }
  0xd8   : > { %2735 = vmatmul.mubr.f32.gmra.mrb[14].mxu0 %v435_v39  ;;  %v628_v39 = vld [vmem:[%s3828_s30 + $0xf0] sm:$0xff]  ;;  %s3544_s30 = smov 1  }
  0xd9   : > { %2849 = vmatprep.mubr.f32.mxu0 %v855_v3 }
 0x18f   : > { %v2715_v41 = vpop.f32.mrb[0].mxu0 }
 0x190   : > { %v518_v42 = vpop.f32.mrb[1].mxu0 }
 0x191   : > { %v3089_v43 = vpack.c.bf16 %v2715_v41, %v518_v42  ;;  %v3300_v44 = vpack.i.bf16 %v2715_v41, %v518_v42  ;;  %v1176_v41 = vld [vmem:[%s3837_s23] sm:$0xff]  ;;  %v1177_v42 = vld [vmem:[%s3837_s23 + $0x8] sm:$0xff] }
 0x193   : > { %3301 = vrot.lane.b32.xlu0 %v3300_v44, %s3542_s4  ;;  %v2718_v45 = vpop.f32.mrb[2].mxu0  ;;  %3090 = vmatprep.subr.bf16.mxu1 %v3089_v43  ;;  %v1179_v44 = vld [vmem:[%s3837_s23 + $0x18] sm:$0xff] }
 0x194   : > { %v528_v46 = vpop.f32.mrb[3].mxu0  ;;  %3092 = vmatpush3.bf16.msra.mxu1 %v3089_v43 }
 0x195   : > { %v3305_v47 = vpack.i.bf16 %v2718_v45, %v528_v46  ;;  %v3093_v48 = vpack.c.bf16 %v2718_v45, %v528_v46  ;;  %v1180_v45 = vld [vmem:[%s3837_s23 + $0x20] sm:$0xff]  ;;  %v1181_v46 = vld [vmem:[%s3837_s23 + $0x28] sm:$0xff] }
 0x197   : > { %3306 = vrot.lane.b32.xlu0 %v3305_v47, %s3542_s4  ;;  %v2721_v49 = vpop.f32.mrb[4].mxu0  ;;  %3094 = vmatprep.subr.bf16.mxu1 %v3093_v48  ;;  %v1182_v47 = vld [vmem:[%s3837_s23 + $0x30] sm:$0xff] }
 0x198   : > { %v538_v50 = vpop.f32.mrb[5].mxu0  ;;  %3096 = vmatpush3.bf16.msra.mxu1 %v3093_v48 }
 0x199   : > { %v3097_v51 = vpack.c.bf16 %v2721_v49, %v538_v50  ;;  %v3310_v52 = vpack.i.bf16 %v2721_v49, %v538_v50  ;;  %v1184_v49 = vld [vmem:[%s3837_s23 + $0x40] sm:$0xff]  ;;  %v1185_v50 = vld [vmem:[%s3837_s23 + $0x48] sm:$0xff] }
 0x19b   : > { %3311 = vrot.lane.b32.xlu1 %v3310_v52, %s3542_s4  ;;  %v2724_v53 = vpop.f32.mrb[6].mxu0  ;;  %3098 = vmatprep.subr.bf16.mxu1 %v3097_v51  ;;  %v1187_v52 = vld [vmem:[%s3837_s23 + $0x58] sm:$0xff] }
 0x19c   : > { %v548_v54 = vpop.f32.mrb[7].mxu0  ;;  %3100 = vmatpush3.bf16.msra.mxu1 %v3097_v51 }
 0x19d   : > { %v3315_v55 = vpack.i.bf16 %v2724_v53, %v548_v54  ;;  %v3101_v56 = vpack.c.bf16 %v2724_v53, %v548_v54  ;;  %v1188_v54 = vld [vmem:[%s3837_s23 + $0x60] sm:$0xff] }
 0x19f   : > { %3316 = vrot.lane.b32.xlu1 %v3315_v55, %s3542_s4  ;;  %v2727_v57 = vpop.f32.mrb[8].mxu0  ;;  %3102 = vmatprep.subr.bf16.mxu1 %v3101_v56 }
 0x1a0   : > { %v558_v58 = vpop.f32.mrb[9].mxu0  ;;  %3104 = vmatpush3.bf16.msra.mxu1 %v3101_v56 }
 0x1a1   : > { %v3320_v59 = vpack.i.bf16 %v2727_v57, %v558_v58  ;;  %v3105_v60 = vpack.c.bf16 %v2727_v57, %v558_v58 }
 0x1a3   : > { %3321 = vrot.lane.b32.xlu0 %v3320_v59, %s3542_s4  ;;  %v2730_v61 = vpop.f32.mrb[10].mxu0  ;;  %3106 = vmatprep.subr.bf16.mxu1 %v3105_v60  ;;  %v1189_v59 = vld [vmem:[%s3837_s23 + $0x68] sm:$0xff] }
 0x1a4   : > { %v568_v62 = vpop.f32.mrb[11].mxu0  ;;  %3108 = vmatpush3.bf16.msra.mxu1 %v3105_v60 }
 0x1a5   : > { %v3325_v63 = vpack.i.bf16 %v2730_v61, %v568_v62  ;;  %v3109_v0 = vpack.c.bf16 %v2730_v61, %v568_v62  ;;  %v1190_v62 = vld [vmem:[%s3837_s23 + $0x70] sm:$0xff] }
 0x1a7   : > { %3326 = vrot.lane.b32.xlu1 %v3325_v63, %s3542_s4  ;;  %v2733_v1 = vpop.f32.mrb[12].mxu0  ;;  %3110 = vmatprep.subr.bf16.mxu1 %v3109_v0 }
 0x1a8   : > { %v578_v2 = vpop.f32.mrb[13].mxu0  ;;  %3112 = vmatpush3.bf16.msra.mxu1 %v3109_v0 }
 0x1a9   : > { %v3330_v4 = vpack.i.bf16 %v2733_v1, %v578_v2  ;;  %v3113_v5 = vpack.c.bf16 %v2733_v1, %v578_v2  ;;  %v1191_v1 = vld [vmem:[%s3837_s23 + $0x78] sm:$0xff] }
 0x1ab   : > { %3331 = vrot.lane.b32.xlu0 %v3330_v4, %s3542_s4  ;;  %v2736_v6 = vpop.f32.mrb[14].mxu0  ;;  %3114 = vmatprep.subr.bf16.mxu1 %v3113_v5  ;;  %v1192_v4 = vld [vmem:[%s3837_s23 + $0x80] sm:$0xff] }
 0x1ac   : > { %v588_v7 = vpop.f32.mrb[15].mxu0  ;;  %3116 = vmatpush3.bf16.msra.mxu1 %v3113_v5 }
 0x1ad   : > { %v3335_v8 = vpack.i.bf16 %v2736_v6, %v588_v7  ;;  %v3117_v9 = vpack.c.bf16 %v2736_v6, %v588_v7  ;;  %v1193_v7 = vld [vmem:[%s3837_s23 + $0x88] sm:$0xff] }
 0x1af   : > { %3336 = vrot.lane.b32.xlu1 %v3335_v8, %s3542_s4  ;;  %3118 = vmatprep.subr.bf16.mxu1 %v3117_v9 }
 0x1b0   : > { %3120 = vmatpush3.bf16.msra.mxu1 %v3117_v9 }
 0x1b1   : > { %3154 = vmatprep.subr.bf16.mxu1 %v3089_v43 }
 0x1b3   : > { %2770 = vmatmul.mubr.f32.vlgmr.msra.gmra.mrb[0].mxu1 %v599_v10  ;;  %v1194_v10 = vld [vmem:[%s3837_s23 + $0x90] sm:$0xff] }
 0x1b4   : > { %3156 = vmatpush3.bf16.msra.mxu1 %v3089_v43  ;;  %2772 = vmatprep.mubr.f32.mxu1 %v600_v11  ;;  %v1178_v43 = vld [vmem:[%s3837_s23 + $0x10] sm:$0xff] }
 0x1b5   : > { %3158 = vmatprep.subr.bf16.mxu1 %v3093_v48 }
 0x1b7   : > { %2773 = vmatmul.mubr.f32.gmra.mrb[2].mxu1 %v601_v12 }
 0x1b8   : > { %3160 = vmatpush3.bf16.msra.mxu1 %v3093_v48  ;;  %2775 = vmatprep.mubr.f32.mxu1 %v602_v13  ;;  %v1183_v48 = vld [vmem:[%s3837_s23 + $0x38] sm:$0xff] }
 0x1b9   : > { %3162 = vmatprep.subr.bf16.mxu1 %v3097_v51  ;;  %v1195_v13 = vld [vmem:[%s3837_s23 + $0x98] sm:$0xff] }
 0x1bb   : > { %2776 = vmatmul.mubr.f32.gmra.mrb[4].mxu1 %v603_v14 }
 0x1bc   : > { %3164 = vmatpush3.bf16.msra.mxu1 %v3097_v51  ;;  %2778 = vmatprep.mubr.f32.mxu1 %v604_v15  ;;  %v1186_v51 = vld [vmem:[%s3837_s23 + $0x50] sm:$0xff] }
 0x1bd   : > { %3166 = vmatprep.subr.bf16.mxu1 %v3101_v56 }
 0x1bf   : > { %2779 = vmatmul.mubr.f32.gmra.mrb[6].mxu1 %v605_v16  ;;  %v1196_v16 = vld [vmem:[%s3837_s23 + $0xa0] sm:$0xff] }
 0x1c0   : > { %3168 = vmatpush3.bf16.msra.mxu1 %v3101_v56  ;;  %2781 = vmatprep.mubr.f32.mxu1 %v606_v17 }
 0x1c1   : > { %3170 = vmatprep.subr.bf16.mxu1 %v3105_v60 }
 0x1c3   : > { %2782 = vmatmul.mubr.f32.gmra.mrb[8].mxu1 %v607_v18 }
 0x1c4   : > { %3172 = vmatpush3.bf16.msra.mxu1 %v3105_v60  ;;  %2784 = vmatprep.mubr.f32.mxu1 %v608_v19  ;;  %v1197_v19 = vld [vmem:[%s3837_s23 + $0xa8] sm:$0xff] }
 0x1c5   : > { %3174 = vmatprep.subr.bf16.mxu1 %v3109_v0 }
 0x1c7   : > { %2785 = vmatmul.mubr.f32.gmra.mrb[10].mxu1 %v609_v20 }
 0x1c8   : > { %3176 = vmatpush3.bf16.msra.mxu1 %v3109_v0  ;;  %2787 = vmatprep.mubr.f32.mxu1 %v610_v21 }
 0x1c9   : > { %3178 = vmatprep.subr.bf16.mxu1 %v3113_v5 }
 0x1cb   : > { %2788 = vmatmul.mubr.f32.gmra.mrb[12].mxu1 %v611_v22  ;;  %v1198_v22 = vld [vmem:[%s3837_s23 + $0xb0] sm:$0xff] }
 0x1cc   : > { %3180 = vmatpush3.bf16.msra.mxu1 %v3113_v5  ;;  %2790 = vmatprep.mubr.f32.mxu1 %v612_v23 }
 0x1cd   : > { %3182 = vmatprep.subr.bf16.mxu1 %v3117_v9 }
 0x1cf   : > { %2791 = vmatmul.mubr.f32.gmra.mrb[14].mxu1 %v613_v24 }
 0x1d0   : > { %3184 = vmatpush3.bf16.msra.mxu1 %v3117_v9  ;;  %2793 = vmatprep.mubr.f32.mxu1 %v614_v25  ;;  %v1199_v25 = vld [vmem:[%s3837_s23 + $0xb8] sm:$0xff] }
 0x1d3   : > { %2794 = vmatmul.mubr.f32.gmra.mrb[16].mxu1 %v615_v26 }
 0x1d4   : > { %2796 = vmatprep.mubr.f32.mxu1 %v616_v27 }
 0x1d7   : > { %2797 = vmatmul.mubr.f32.gmra.mrb[18].mxu1 %v617_v28  ;;  %v1200_v28 = vld [vmem:[%s3837_s23 + $0xc0] sm:$0xff] }
 0x1d8   : > { %2799 = vmatprep.mubr.f32.mxu1 %v618_v29 }
 0x1db   : > { %2800 = vmatmul.mubr.f32.gmra.mrb[20].mxu1 %v619_v30 }
 0x1dc   : > { %2802 = vmatprep.mubr.f32.mxu1 %v620_v31  ;;  %v1201_v31 = vld [vmem:[%s3837_s23 + $0xc8] sm:$0xff] }
 0x1df   : > { %2803 = vmatmul.mubr.f32.gmra.mrb[22].mxu1 %v621_v32 }
 0x1e0   : > { %2805 = vmatprep.mubr.f32.mxu1 %v622_v33 }
 0x1e3   : > { %2806 = vmatmul.mubr.f32.gmra.mrb[24].mxu1 %v623_v34  ;;  %v1202_v34 = vld [vmem:[%s3837_s23 + $0xd0] sm:$0xff] }
 0x1e4   : > { %2808 = vmatprep.mubr.f32.mxu1 %v624_v35 }
 0x1e7   : > { %2809 = vmatmul.mubr.f32.gmra.mrb[26].mxu1 %v625_v36  ;;  %v1203_v36 = vld [vmem:[%s3837_s23 + $0xd8] sm:$0xff] }
 0x1e8   : > { %2811 = vmatprep.mubr.f32.mxu1 %v626_v37  ;;  %v1204_v37 = vld [vmem:[%s3837_s23 + $0xe0] sm:$0xff] }
 0x1eb   : > { %2812 = vmatmul.mubr.f32.gmra.mrb[28].mxu1 %v627_v38  ;;  %v856_v38 = vld [vmem:[%s3821_s18 + $0x8] sm:$0xff] }
 0x1ec   : > { %2814 = vmatprep.mubr.f32.mxu1 %v628_v39  ;;  %v857_v39 = vld [vmem:[%s3821_s18 + $0x10] sm:$0xff] }
 0x1ef   : > { %2815 = vmatmul.mubr.f32.gmra.mrb[30].mxu1 %v629_v40  ;;  %v1205_v40 = vld [vmem:[%s3837_s23 + $0xe8] sm:$0xff] }
 0x1f0   : > { %2929 = vmatprep.mubr.f32.mxu1 %v1176_v41  ;;  %v1206_v41 = vld [vmem:[%s3837_s23 + $0xf0] sm:$0xff] }
 0x1f3   : > { %2930 = vmatmul.mubr.f32.vlgmr.msra.gmra.mrb[32].mxu1 %v1177_v42  ;;  %v858_v42 = vld [vmem:[%s3821_s18 + $0x18] sm:$0xff] }
 0x1f4   : > { %2932 = vmatprep.mubr.f32.mxu1 %v1178_v43  ;;  %v859_v43 = vld [vmem:[%s3821_s18 + $0x20] sm:$0xff] }
 0x1f7   : > { %2933 = vmatmul.mubr.f32.gmra.mrb[34].mxu1 %v1179_v44  ;;  %v1207_v44 = vld [vmem:[%s3837_s23 + $0xf8] sm:$0xff]  ;;  %s597_s23 = sld [smem:[#allocation2]] }
 0x1f8   : > { %2935 = vmatprep.mubr.f32.mxu1 %v1180_v45  ;;  %v1457_v45 = vld [vmem:[%s3834_s21 + $0xc0] sm:$0xff] }
 0x1fb   : > { %2936 = vmatmul.mubr.f32.gmra.mrb[36].mxu1 %v1181_v46  ;;  %v860_v46 = vld [vmem:[%s3821_s18 + $0x28] sm:$0xff] }
 0x1fc   : > { %2938 = vmatprep.mubr.f32.mxu1 %v1182_v47  ;;  %v861_v47 = vld [vmem:[%s3821_s18 + $0x30] sm:$0xff] }
 0x1ff   : > { %2939 = vmatmul.mubr.f32.gmra.mrb[38].mxu1 %v1183_v48  ;;  %v1458_v48 = vld [vmem:[%s3834_s21 + $0xc8] sm:$0xff] }
 0x200   : > { %2941 = vmatprep.mubr.f32.mxu1 %v1184_v49  ;;  %v1459_v49 = vld [vmem:[%s3834_s21 + $0xd0] sm:$0xff] }
 0x203   : > { %2942 = vmatmul.mubr.f32.gmra.mrb[40].mxu1 %v1185_v50  ;;  %v862_v50 = vld [vmem:[%s3821_s18 + $0x38] sm:$0xff] }
 0x204   : > { %2944 = vmatprep.mubr.f32.mxu1 %v1186_v51  ;;  %v863_v51 = vld [vmem:[%s3821_s18 + $0x40] sm:$0xff] }
 0x205   : > { %v3302_v53 = vpop.permute.xlu0 %3301 }
 0x206   : > { %v3304_v55 = vunpack.i.h.bf16 %v3302_v53  ;;  %v3303_v56 = vunpack.i.l.bf16 %v3302_v53  ;;  %v1461_v53 = vld [vmem:[%s3834_s21 + $0xe0] sm:$0xff] }
 0x207   : > { %2945 = vmatmul.mubr.f32.gmra.mrb[42].mxu1 %v1187_v52  ;;  %v1460_v52 = vld [vmem:[%s3834_s21 + $0xd8] sm:$0xff] }
 0x208   : > { %v3993_v57 = vpack.c.bf16 %v3304_v55, %v3303_v56  ;;  %2947 = vmatprep.mubr.f32.mxu1 %v1188_v54  ;;  %v864_v54 = vld [vmem:[%s3821_s18 + $0x48] sm:$0xff]  ;;  %v865_v55 = vld [vmem:[%s3821_s18 + $0x50] sm:$0xff] }
 0x209   : > { %v3307_v58 = vpop.permute.xlu0 %3306  ;;  %v1462_v56 = vld [vmem:[%s3834_s21 + $0xe8] sm:$0xff] }
 0x20a   : > { %v3309_v60 = vunpack.i.h.bf16 %v3307_v58  ;;  %v3308_v61 = vunpack.i.l.bf16 %v3307_v58  ;;  %3122 = vmatprep.subr.bf16.mxu0 %v3993_v57  ;;  %3217 = vmatprep.subr.bf16.mxu1 %v3993_v57  ;;  %v866_v58 = vld [vmem:[%s3821_s18 + $0x58] sm:$0xff] }
 0x20b   : > { %3124 = vmatpush3.bf16.msra.mxu0 %v3993_v57  ;;  %3225 = vmatpush3.bf16.msra.mxu1 %v3993_v57 }
 0x20c   : > { %v4001_v63 = vpack.c.bf16 %v3309_v60, %v3308_v61  ;;  %2948 = vmatmul.mubr.f32.gmra.mrb[44].mxu1 %v1189_v59  ;;  %v867_v59 = vld [vmem:[%s3821_s18 + $0x60] sm:$0xff]  ;;  %v1464_v60 = vld [vmem:[%s3834_s21 + $0xf8] sm:$0xff]  ;;  %v868_v61 = vld [vmem:[%s3821_s18 + $0x68] sm:$0xff] }
 0x20d   : > { %v3312_v0 = vpop.permute.xlu1 %3311  ;;  %2950 = vmatprep.mubr.f32.mxu1 %v1190_v62  ;;  %v869_v62 = vld [vmem:[%s3821_s18 + $0x70] sm:$0xff] }
 0x20e   : > { %v3314_v2 = vunpack.i.h.bf16 %v3312_v0  ;;  %v3313_v3 = vunpack.i.l.bf16 %v3312_v0  ;;  %3126 = vmatprep.subr.bf16.mxu0 %v4001_v63  ;;  %3218 = vmatprep.subr.bf16.mxu1 %v4001_v63  ;;  %v871_v0 = vld [vmem:[%s3821_s18 + $0x80] sm:$0xff] }
 0x20f   : > { %3128 = vmatpush3.bf16.msra.mxu0 %v4001_v63  ;;  %3226 = vmatpush3.bf16.msra.mxu1 %v4001_v63 }
 0x210   : > { %v4009_v5 = vpack.c.bf16 %v3314_v2, %v3313_v3  ;;  %2951 = vmatmul.mubr.f32.gmra.mrb[46].mxu1 %v1191_v1  ;;  %v872_v1 = vld [vmem:[%s3821_s18 + $0x88] sm:$0xff]  ;;  %v873_v2 = vld [vmem:[%s3821_s18 + $0x90] sm:$0xff]  ;;  %v874_v3 = vld [vmem:[%s3821_s18 + $0x98] sm:$0xff] }
 0x211   : > { %v3317_v6 = vpop.permute.xlu1 %3316  ;;  %2953 = vmatprep.mubr.f32.mxu1 %v1192_v4  ;;  %v875_v4 = vld [vmem:[%s3821_s18 + $0xa0] sm:$0xff] }
 0x212   : > { %v3319_v8 = vunpack.i.h.bf16 %v3317_v6  ;;  %v3318_v9 = vunpack.i.l.bf16 %v3317_v6  ;;  %3130 = vmatprep.subr.bf16.mxu0 %v4009_v5  ;;  %3219 = vmatprep.subr.bf16.mxu1 %v4009_v5  ;;  %v877_v6 = vld [vmem:[%s3821_s18 + $0xb0] sm:$0xff] }
 0x213   : > { %3132 = vmatpush3.bf16.msra.mxu0 %v4009_v5  ;;  %3227 = vmatpush3.bf16.msra.mxu1 %v4009_v5 }
 0x214   : > { %v4017_v11 = vpack.c.bf16 %v3319_v8, %v3318_v9  ;;  %2954 = vmatmul.mubr.f32.gmra.mrb[48].mxu1 %v1193_v7  ;;  %v878_v7 = vld [vmem:[%s3821_s18 + $0xb8] sm:$0xff]  ;;  %v879_v8 = vld [vmem:[%s3821_s18 + $0xc0] sm:$0xff]  ;;  %v880_v9 = vld [vmem:[%s3821_s18 + $0xc8] sm:$0xff] }
 0x215   : > { %v3322_v12 = vpop.permute.xlu0 %3321  ;;  %2956 = vmatprep.mubr.f32.mxu1 %v1194_v10  ;;  %v881_v10 = vld [vmem:[%s3821_s18 + $0xd0] sm:$0xff] }
 0x216   : > { %v3324_v14 = vunpack.i.h.bf16 %v3322_v12  ;;  %v3323_v15 = vunpack.i.l.bf16 %v3322_v12  ;;  %3134 = vmatprep.subr.bf16.mxu0 %v4017_v11  ;;  %3220 = vmatprep.subr.bf16.mxu1 %v4017_v11  ;;  %v883_v12 = vld [vmem:[%s3821_s18 + $0xe0] sm:$0xff] }
 0x217   : > { %3136 = vmatpush3.bf16.msra.mxu0 %v4017_v11  ;;  %3228 = vmatpush3.bf16.msra.mxu1 %v4017_v11 }
 0x218   : > { %v4025_v17 = vpack.c.bf16 %v3324_v14, %v3323_v15  ;;  %2957 = vmatmul.mubr.f32.gmra.mrb[50].mxu1 %v1195_v13  ;;  %v884_v13 = vld [vmem:[%s3821_s18 + $0xe8] sm:$0xff]  ;;  %v885_v14 = vld [vmem:[%s3821_s18 + $0xf0] sm:$0xff]  ;;  %v886_v15 = vld [vmem:[%s3821_s18 + $0xf8] sm:$0xff] }
 0x219   : > { %v3327_v18 = vpop.permute.xlu1 %3326  ;;  %2959 = vmatprep.mubr.f32.mxu1 %v1196_v16  ;;  %v1433_v16 = vld [vmem:[%s3834_s21] sm:$0xff] }
 0x21a   : > { %v3329_v20 = vunpack.i.h.bf16 %v3327_v18  ;;  %v3328_v21 = vunpack.i.l.bf16 %v3327_v18  ;;  %3138 = vmatprep.subr.bf16.mxu0 %v4025_v17  ;;  %3221 = vmatprep.subr.bf16.mxu1 %v4025_v17  ;;  %v1435_v18 = vld [vmem:[%s3834_s21 + $0x10] sm:$0xff] }
 0x21b   : > { %3140 = vmatpush3.bf16.msra.mxu0 %v4025_v17  ;;  %3229 = vmatpush3.bf16.msra.mxu1 %v4025_v17 }
 0x21c   : > { %v4033_v23 = vpack.c.bf16 %v3329_v20, %v3328_v21  ;;  %2960 = vmatmul.mubr.f32.gmra.mrb[52].mxu1 %v1197_v19  ;;  %v1436_v19 = vld [vmem:[%s3834_s21 + $0x18] sm:$0xff]  ;;  %v1437_v20 = vld [vmem:[%s3834_s21 + $0x20] sm:$0xff]  ;;  %v1438_v21 = vld [vmem:[%s3834_s21 + $0x28] sm:$0xff] }
 0x21d   : > { %v3332_v24 = vpop.permute.xlu0 %3331  ;;  %2962 = vmatprep.mubr.f32.mxu1 %v1198_v22  ;;  %v1439_v22 = vld [vmem:[%s3834_s21 + $0x30] sm:$0xff] }
 0x21e   : > { %v3334_v26 = vunpack.i.h.bf16 %v3332_v24  ;;  %v3333_v27 = vunpack.i.l.bf16 %v3332_v24  ;;  %3142 = vmatprep.subr.bf16.mxu0 %v4033_v23  ;;  %3222 = vmatprep.subr.bf16.mxu1 %v4033_v23  ;;  %v1441_v24 = vld [vmem:[%s3834_s21 + $0x40] sm:$0xff] }
 0x21f   : > { %3144 = vmatpush3.bf16.msra.mxu0 %v4033_v23  ;;  %3230 = vmatpush3.bf16.msra.mxu1 %v4033_v23 }
 0x220   : > { %v4041_v29 = vpack.c.bf16 %v3334_v26, %v3333_v27  ;;  %2963 = vmatmul.mubr.f32.gmra.mrb[54].mxu1 %v1199_v25  ;;  %v1442_v25 = vld [vmem:[%s3834_s21 + $0x48] sm:$0xff]  ;;  %v1443_v26 = vld [vmem:[%s3834_s21 + $0x50] sm:$0xff]  ;;  %v1444_v27 = vld [vmem:[%s3834_s21 + $0x58] sm:$0xff] }
 0x221   : > { %v3337_v30 = vpop.permute.xlu1 %3336  ;;  %2965 = vmatprep.mubr.f32.mxu1 %v1200_v28  ;;  %v1445_v28 = vld [vmem:[%s3834_s21 + $0x60] sm:$0xff] }
 0x222   : > { %v3339_v32 = vunpack.i.h.bf16 %v3337_v30  ;;  %v3338_v33 = vunpack.i.l.bf16 %v3337_v30  ;;  %3146 = vmatprep.subr.bf16.mxu0 %v4041_v29  ;;  %3223 = vmatprep.subr.bf16.mxu1 %v4041_v29  ;;  %v1447_v30 = vld [vmem:[%s3834_s21 + $0x70] sm:$0xff] }
 0x223   : > { %3148 = vmatpush3.bf16.msra.mxu0 %v4041_v29  ;;  %3231 = vmatpush3.bf16.msra.mxu1 %v4041_v29 }
 0x224   : > { %v4049_v35 = vpack.c.bf16 %v3339_v32, %v3338_v33  ;;  %2966 = vmatmul.mubr.f32.gmra.mrb[56].mxu1 %v1201_v31  ;;  %v1448_v31 = vld [vmem:[%s3834_s21 + $0x78] sm:$0xff]  ;;  %v1449_v32 = vld [vmem:[%s3834_s21 + $0x80] sm:$0xff] }
 0x225   : > { %2968 = vmatprep.mubr.f32.mxu1 %v1202_v34 }
 0x226   : > { %3150 = vmatprep.subr.bf16.mxu0 %v4049_v35  ;;  %3224 = vmatprep.subr.bf16.mxu1 %v4049_v35 }
 0x227   : > { %3152 = vmatpush3.bf16.msra.mxu0 %v4049_v35  ;;  %3232 = vmatpush3.bf16.msra.mxu1 %v4049_v35 }
 0x228   : > { %3186 = vmatprep.subr.bf16.mxu0 %v3993_v57  ;;  %2969 = vmatmul.mubr.f32.gmra.mrb[58].mxu1 %v1203_v36  ;;  %v1451_v36 = vld [vmem:[%s3834_s21 + $0x90] sm:$0xff] }
 0x229   : > { %2971 = vmatprep.mubr.f32.mxu1 %v1204_v37 }
 0x22a   : > { %2850 = vmatmul.mubr.f32.vlgmr.msra.gmra.mrb[16].mxu0 %v856_v38 }
 0x22b   : > { %3188 = vmatpush3.bf16.msra.mxu0 %v3993_v57  ;;  %2852 = vmatprep.mubr.f32.mxu0 %v857_v39  ;;  %v1463_v57 = vld [vmem:[%s3834_s21 + $0xf0] sm:$0xff]  ;;  %v1452_v39 = vld [vmem:[%s3834_s21 + $0x98] sm:$0xff] }
 0x22c   : > { %3190 = vmatprep.subr.bf16.mxu0 %v4001_v63  ;;  %2972 = vmatmul.mubr.f32.gmra.mrb[60].mxu1 %v1205_v40  ;;  %v1453_v40 = vld [vmem:[%s3834_s21 + $0xa0] sm:$0xff] }
 0x22d   : > { %2974 = vmatprep.mubr.f32.mxu1 %v1206_v41 }
 0x22e   : > { %2853 = vmatmul.mubr.f32.gmra.mrb[18].mxu0 %v858_v42 }
 0x22f   : > { %3192 = vmatpush3.bf16.msra.mxu0 %v4001_v63  ;;  %2855 = vmatprep.mubr.f32.mxu0 %v859_v43  ;;  %v870_v63 = vld [vmem:[%s3821_s18 + $0x78] sm:$0xff]  ;;  %v1454_v43 = vld [vmem:[%s3834_s21 + $0xa8] sm:$0xff] }
 0x230   : > { %3194 = vmatprep.subr.bf16.mxu0 %v4009_v5  ;;  %2975 = vmatmul.mubr.f32.gmra.mrb[62].mxu1 %v1207_v44  ;;  %v1455_v44 = vld [vmem:[%s3834_s21 + $0xb0] sm:$0xff] }
 0x231   : > { %3045 = vmatprep.mubr.f32.mxu1 %v1457_v45 }
 0x232   : > { %2856 = vmatmul.mubr.f32.gmra.mrb[20].mxu0 %v860_v46 }
 0x233   : > { %3196 = vmatpush3.bf16.msra.mxu0 %v4009_v5  ;;  %2858 = vmatprep.mubr.f32.mxu0 %v861_v47  ;;  %v876_v5 = vld [vmem:[%s3821_s18 + $0xa8] sm:$0xff]  ;;  %v1456_v47 = vld [vmem:[%s3834_s21 + $0xb8] sm:$0xff] }
 0x234   : > { %3198 = vmatprep.subr.bf16.mxu0 %v4017_v11  ;;  %3046 = vmatmul.mubr.f32.vlgmr.msra.gmra.mrb[64].mxu1 %v1458_v48 }
 0x235   : > { %3048 = vmatprep.mubr.f32.mxu1 %v1459_v49 }
 0x236   : > { %2859 = vmatmul.mubr.f32.gmra.mrb[22].mxu0 %v862_v50 }
 0x237   : > { %3200 = vmatpush3.bf16.msra.mxu0 %v4017_v11  ;;  %2861 = vmatprep.mubr.f32.mxu0 %v863_v51  ;;  %v882_v11 = vld [vmem:[%s3821_s18 + $0xd8] sm:$0xff]  ;;  %s3543_s18 = smov 2  }
 0x238   : > { %3202 = vmatprep.subr.bf16.mxu0 %v4025_v17  ;;  %3049 = vmatmul.mubr.f32.gmra.mrb[66].mxu1 %v1460_v52 }
 0x239   : > { %3051 = vmatprep.mubr.f32.mxu1 %v1461_v53 }
 0x23a   : > { %2862 = vmatmul.mubr.f32.gmra.mrb[24].mxu0 %v864_v54 }
 0x23b   : > { %3204 = vmatpush3.bf16.msra.mxu0 %v4025_v17  ;;  %2864 = vmatprep.mubr.f32.mxu0 %v865_v55  ;;  %v1434_v17 = vld [vmem:[%s3834_s21 + $0x8] sm:$0xff] }
 0x23c   : > { %3206 = vmatprep.subr.bf16.mxu0 %v4033_v23  ;;  %3052 = vmatmul.mubr.f32.gmra.mrb[68].mxu1 %v1462_v56 }
 0x23d   : > { %3054 = vmatprep.mubr.f32.mxu1 %v1463_v57 }
 0x23e   : > { %2865 = vmatmul.mubr.f32.gmra.mrb[26].mxu0 %v866_v58 }
 0x23f   : > { %3208 = vmatpush3.bf16.msra.mxu0 %v4033_v23  ;;  %2867 = vmatprep.mubr.f32.mxu0 %v867_v59  ;;  %v1440_v23 = vld [vmem:[%s3834_s21 + $0x38] sm:$0xff] }
 0x240   : > { %3210 = vmatprep.subr.bf16.mxu0 %v4041_v29  ;;  %3055 = vmatmul.mubr.f32.gmra.mrb[70].mxu1 %v1464_v60 }
 0x242   : > { %2868 = vmatmul.mubr.f32.gmra.mrb[28].mxu0 %v868_v61 }
 0x243   : > { %3212 = vmatpush3.bf16.msra.mxu0 %v4041_v29  ;;  %2870 = vmatprep.mubr.f32.mxu0 %v869_v62  ;;  %v1446_v29 = vld [vmem:[%s3834_s21 + $0x68] sm:$0xff] }
 0x244   : > { %3214 = vmatprep.subr.bf16.mxu0 %v4049_v35 }
 0x246   : > { %2871 = vmatmul.mubr.f32.gmra.mrb[30].mxu0 %v870_v63 }
 0x247   : > { %3216 = vmatpush3.bf16.msra.mxu0 %v4049_v35  ;;  %2873 = vmatprep.mubr.f32.mxu0 %v871_v0  ;;  %v1450_v35 = vld [vmem:[%s3834_s21 + $0x88] sm:$0xff]  ;;  %s3545_s21 = smov 3  }
 0x24a   : > { %2874 = vmatmul.mubr.f32.gmra.mrb[32].mxu0 %v872_v1 }
 0x24b   : > { %2876 = vmatprep.mubr.f32.mxu0 %v873_v2 }
 0x24e   : > { %2877 = vmatmul.mubr.f32.gmra.mrb[34].mxu0 %v874_v3 }
 0x24f   : > { %2879 = vmatprep.mubr.f32.mxu0 %v875_v4 }
 0x252   : > { %2880 = vmatmul.mubr.f32.gmra.mrb[36].mxu0 %v876_v5 }
 0x253   : > { %2882 = vmatprep.mubr.f32.mxu0 %v877_v6 }
 0x256   : > { %2883 = vmatmul.mubr.f32.gmra.mrb[38].mxu0 %v878_v7 }
 0x257   : > { %2885 = vmatprep.mubr.f32.mxu0 %v879_v8 }
 0x25a   : > { %2886 = vmatmul.mubr.f32.gmra.mrb[40].mxu0 %v880_v9 }
 0x25b   : > { %2888 = vmatprep.mubr.f32.mxu0 %v881_v10 }
 0x25e   : > { %2889 = vmatmul.mubr.f32.gmra.mrb[42].mxu0 %v882_v11 }
 0x25f   : > { %2891 = vmatprep.mubr.f32.mxu0 %v883_v12 }
 0x262   : > { %2892 = vmatmul.mubr.f32.gmra.mrb[44].mxu0 %v884_v13 }
 0x263   : > { %2894 = vmatprep.mubr.f32.mxu0 %v885_v14 }
 0x266   : > { %2895 = vmatmul.mubr.f32.gmra.mrb[46].mxu0 %v886_v15 }
 0x267   : > { %3009 = vmatprep.mubr.f32.mxu0 %v1433_v16 }
 0x26a   : > { %3010 = vmatmul.mubr.f32.vlgmr.msra.gmra.mrb[48].mxu0 %v1434_v17 }
 0x26b   : > { %3012 = vmatprep.mubr.f32.mxu0 %v1435_v18 }
 0x26e   : > { %3013 = vmatmul.mubr.f32.gmra.mrb[50].mxu0 %v1436_v19 }
 0x26f   : > { %3015 = vmatprep.mubr.f32.mxu0 %v1437_v20 }
 0x272   : > { %3016 = vmatmul.mubr.f32.gmra.mrb[52].mxu0 %v1438_v21 }
 0x273   : > { %3018 = vmatprep.mubr.f32.mxu0 %v1439_v22 }
 0x276   : > { %3019 = vmatmul.mubr.f32.gmra.mrb[54].mxu0 %v1440_v23 }
 0x277   : > { %3021 = vmatprep.mubr.f32.mxu0 %v1441_v24 }
 0x27a   : > { %3022 = vmatmul.mubr.f32.gmra.mrb[56].mxu0 %v1442_v25 }
 0x27b   : > { %3024 = vmatprep.mubr.f32.mxu0 %v1443_v26 }
 0x27e   : > { %3025 = vmatmul.mubr.f32.gmra.mrb[58].mxu0 %v1444_v27 }
 0x27f   : > { %3027 = vmatprep.mubr.f32.mxu0 %v1445_v28 }
 0x282   : > { %3028 = vmatmul.mubr.f32.gmra.mrb[60].mxu0 %v1446_v29 }
 0x283   : > { %3030 = vmatprep.mubr.f32.mxu0 %v1447_v30 }
 0x286   : > { %v4132_v33 = vpop.f32.mrb[0].mxu1  ;;  %3031 = vmatmul.mubr.f32.gmra.mrb[62].mxu0 %v1448_v31 }
 0x287   : > { %v4134_v34 = vpop.f32.mrb[1].mxu1  ;;  %3033 = vmatprep.mubr.f32.mxu0 %v1449_v32 }
 0x28a   : > { %v4138_v37 = vpop.f32.mrb[2].mxu1  ;;  %3034 = vmatmul.mubr.f32.gmra.mrb[64].mxu0 %v1450_v35 }
 0x28b   : > { %v4140_v38 = vpop.f32.mrb[3].mxu1  ;;  %3036 = vmatprep.mubr.f32.mxu0 %v1451_v36 }
 0x28e   : > { %v4144_v41 = vpop.f32.mrb[4].mxu1  ;;  %3037 = vmatmul.mubr.f32.gmra.mrb[66].mxu0 %v1452_v39 }
 0x28f   : > { %v4146_v42 = vpop.f32.mrb[5].mxu1  ;;  %3039 = vmatprep.mubr.f32.mxu0 %v1453_v40 }
 0x292   : > { %v4150_v45 = vpop.f32.mrb[6].mxu1  ;;  %3040 = vmatmul.mubr.f32.gmra.mrb[68].mxu0 %v1454_v43 }
 0x293   : > { %v4152_v46 = vpop.f32.mrb[7].mxu1  ;;  %3042 = vmatprep.mubr.f32.mxu0 %v1455_v44 }
 0x296   : > { %v4155_v48 = vpop.f32.mrb[8].mxu1  ;;  %3043 = vmatmul.mubr.f32.gmra.mrb[70].mxu0 %v1456_v47 }
 0x297   : > { %v4157_v49 = vpop.f32.mrb[9].mxu1 }
 0x29a   : > { %v4159_v50 = vpop.f32.mrb[10].mxu1 }
 0x29b   : > { %v4161_v51 = vpop.f32.mrb[11].mxu1 }
 0x29e   : > { %v4163_v52 = vpop.f32.mrb[12].mxu1 }
 0x29f   : > { %v4165_v53 = vpop.f32.mrb[13].mxu1 }
 0x2a2   : > { %v4167_v54 = vpop.f32.mrb[14].mxu1 }
 0x2a3   : > { %v4169_v55 = vpop.f32.mrb[15].mxu1 }
 0x2a6   : > { %v4171_v56 = vpop.f32.mrb[16].mxu1 }
 0x2a7   : > { %4773 = vst [vmem:[#allocation19_spill] sm:$0xff] %v4171_v56  ;;  %v4173_v57 = vpop.f32.mrb[17].mxu1 }
 0x2aa   : > { %v4175_v58 = vpop.f32.mrb[18].mxu1 }
 0x2ab   : > { %4774 = vst [vmem:[#allocation20_spill] sm:$0xff] %v4175_v58  ;;  %v4177_v59 = vpop.f32.mrb[19].mxu1 }
 0x2ae   : > { %v4179_v60 = vpop.f32.mrb[20].mxu1 }
 0x2af   : > { %4775 = vst [vmem:[#allocation21_spill] sm:$0xff] %v4179_v60  ;;  %v4181_v61 = vpop.f32.mrb[21].mxu1 }
 0x2b2   : > { %v4183_v62 = vpop.f32.mrb[22].mxu1 }
 0x2b3   : > { %v4185_v63 = vpop.f32.mrb[23].mxu1 }
 0x2b6   : > { %v4187_v0 = vpop.f32.mrb[24].mxu1 }
 0x2b7   : > { %v4189_v1 = vpop.f32.mrb[25].mxu1 }
 0x2ba   : > { %v4191_v2 = vpop.f32.mrb[26].mxu1 }
 0x2bb   : > { %v4193_v3 = vpop.f32.mrb[27].mxu1 }
 0x2be   : > { %v4195_v4 = vpop.f32.mrb[28].mxu1 }
 0x2bf   : > { %v4197_v5 = vpop.f32.mrb[29].mxu1 }
 0x2c2   : > { %v4199_v6 = vpop.f32.mrb[30].mxu1 }
 0x2c3   : > { %v4201_v7 = vpop.f32.mrb[31].mxu1 }
 0x2c6   : > { %v2931_v8 = vpop.f32.mrb[32].mxu1 }
 0x2c7   : > { %1852 = vrot.lane.b32.xlu1 %v2931_v8, %s3543_s18  ;;  %v1274_v9 = vpop.f32.mrb[33].mxu1 }
 0x2c8   : > { %1850 = vrot.lane.b32.xlu0 %v1274_v9, %s3543_s18 }
 0x2ca   : > { %v2934_v10 = vpop.f32.mrb[34].mxu1 }
 0x2cb   : > { %1856 = vrot.lane.b32.xlu1 %v2934_v10, %s3543_s18  ;;  %v1284_v11 = vpop.f32.mrb[35].mxu1 }
 0x2cc   : > { %1854 = vrot.lane.b32.xlu0 %v1284_v11, %s3543_s18 }
 0x2ce   : > { %v2937_v12 = vpop.f32.mrb[36].mxu1 }
 0x2cf   : > { %1860 = vrot.lane.b32.xlu1 %v2937_v12, %s3543_s18  ;;  %v1294_v13 = vpop.f32.mrb[37].mxu1 }
 0x2d0   : > { %1858 = vrot.lane.b32.xlu0 %v1294_v13, %s3543_s18 }
 0x2d2   : > { %v2940_v14 = vpop.f32.mrb[38].mxu1 }
 0x2d3   : > { %1864 = vrot.lane.b32.xlu1 %v2940_v14, %s3543_s18  ;;  %v1304_v15 = vpop.f32.mrb[39].mxu1 }
 0x2d4   : > { %1862 = vrot.lane.b32.xlu0 %v1304_v15, %s3543_s18 }
 0x2d6   : > { %v2943_v16 = vpop.f32.mrb[40].mxu1 }
 0x2d7   : > { %1868 = vrot.lane.b32.xlu1 %v2943_v16, %s3543_s18  ;;  %v1314_v17 = vpop.f32.mrb[41].mxu1 }
 0x2d8   : > { %1866 = vrot.lane.b32.xlu0 %v1314_v17, %s3543_s18 }
 0x2da   : > { %v2946_v18 = vpop.f32.mrb[42].mxu1 }
 0x2db   : > { %1872 = vrot.lane.b32.xlu1 %v2946_v18, %s3543_s18  ;;  %v1324_v19 = vpop.f32.mrb[43].mxu1 }
 0x2dc   : > { %1870 = vrot.lane.b32.xlu0 %v1324_v19, %s3543_s18 }
 0x2df   : > { %v2949_v20 = vpop.f32.mrb[44].mxu1 }
 0x2e0   : > { %1876 = vrot.lane.b32.xlu1 %v2949_v20, %s3543_s18  ;;  %v1334_v21 = vpop.f32.mrb[45].mxu1 }
 0x2e1   : > { %1874 = vrot.lane.b32.xlu0 %v1334_v21, %s3543_s18 }
 0x2e3   : > { %v2952_v22 = vpop.f32.mrb[46].mxu1 }
 0x2e4   : > { %1880 = vrot.lane.b32.xlu1 %v2952_v22, %s3543_s18  ;;  %v1344_v23 = vpop.f32.mrb[47].mxu1 }
 0x2e5   : > { %1878 = vrot.lane.b32.xlu0 %v1344_v23, %s3543_s18 }
 0x2e7   : > { %v2955_v24 = vpop.f32.mrb[48].mxu1 }
 0x2e8   : > { %1884 = vrot.lane.b32.xlu1 %v2955_v24, %s3543_s18  ;;  %v1354_v25 = vpop.f32.mrb[49].mxu1 }
 0x2e9   : > { %1882 = vrot.lane.b32.xlu0 %v1354_v25, %s3543_s18 }
 0x2eb   : > { %v2958_v26 = vpop.f32.mrb[50].mxu1 }
 0x2ec   : > { %1888 = vrot.lane.b32.xlu1 %v2958_v26, %s3543_s18  ;;  %v1364_v27 = vpop.f32.mrb[51].mxu1 }
 0x2ed   : > { %1886 = vrot.lane.b32.xlu0 %v1364_v27, %s3543_s18 }
 0x2ef   : > { %v2961_v28 = vpop.f32.mrb[52].mxu1 }
 0x2f0   : > { %1892 = vrot.lane.b32.xlu1 %v2961_v28, %s3543_s18  ;;  %v1374_v29 = vpop.f32.mrb[53].mxu1 }
 0x2f1   : > { %1890 = vrot.lane.b32.xlu0 %v1374_v29, %s3543_s18 }
 0x2f3   : > { %v2964_v30 = vpop.f32.mrb[54].mxu1 }
 0x2f4   : > { %1896 = vrot.lane.b32.xlu1 %v2964_v30, %s3543_s18  ;;  %v1384_v31 = vpop.f32.mrb[55].mxu1 }
 0x2f5   : > { %1894 = vrot.lane.b32.xlu0 %v1384_v31, %s3543_s18 }
 0x2f7   : > { %v2967_v32 = vpop.f32.mrb[56].mxu1 }
 0x2f8   : > { %1900 = vrot.lane.b32.xlu1 %v2967_v32, %s3543_s18  ;;  %v1394_v35 = vpop.f32.mrb[57].mxu1 }
 0x2f9   : > { %1898 = vrot.lane.b32.xlu0 %v1394_v35, %s3543_s18 }
 0x2fb   : > { %v2970_v36 = vpop.f32.mrb[58].mxu1 }
 0x2fc   : > { %v1404_v39 = vpop.f32.mrb[59].mxu1 }
 0x2fd   : > { %v2851_v40 = vpop.f32.mrb[16].mxu0 }
 0x2fe   : > { %v1017_v43 = vpop.f32.mrb[17].mxu0  ;;  %1724 = vrot.lane.b32.xlu1 %v2851_v40, %s3544_s30 }
 0x2ff   : > { %1722 = vrot.lane.b32.xlu0 %v1017_v43, %s3544_s30  ;;  %v2973_v44 = vpop.f32.mrb[60].mxu1 }
 0x300   : > { %v1414_v47 = vpop.f32.mrb[61].mxu1 }
 0x301   : > { %v2854_v8 = vpop.f32.mrb[18].mxu0 }
 0x302   : > { %1904 = vrot.lane.b32.xlu1 %v2970_v36, %s3543_s18  ;;  %v1027_v9 = vpop.f32.mrb[19].mxu0 }
 0x303   : > { %1902 = vrot.lane.b32.xlu0 %v1404_v39, %s3543_s18  ;;  %v2976_v10 = vpop.f32.mrb[62].mxu1 }
 0x304   : > { %v1424_v11 = vpop.f32.mrb[63].mxu1 }
 0x305   : > { %v2857_v12 = vpop.f32.mrb[20].mxu0 }
 0x306   : > { %1728 = vrot.lane.b32.xlu1 %v2854_v8, %s3544_s30  ;;  %v1037_v13 = vpop.f32.mrb[21].mxu0 }
 0x307   : > { %1726 = vrot.lane.b32.xlu0 %v1027_v9, %s3544_s30  ;;  %v3047_v14 = vpop.f32.mrb[64].mxu1 }
 0x308   : > { %v1651_v15 = vpop.f32.mrb[65].mxu1 }
 0x309   : > { %v2860_v16 = vpop.f32.mrb[22].mxu0 }
 0x30a   : > { %1908 = vrot.lane.b32.xlu1 %v2973_v44, %s3543_s18  ;;  %v1047_v17 = vpop.f32.mrb[23].mxu0 }
 0x30b   : > { %1906 = vrot.lane.b32.xlu0 %v1414_v47, %s3543_s18  ;;  %v3050_v18 = vpop.f32.mrb[66].mxu1 }
 0x30c   : > { %v1661_v19 = vpop.f32.mrb[67].mxu1 }
 0x30d   : > { %v2863_v20 = vpop.f32.mrb[24].mxu0 }
 0x30e   : > { %1732 = vrot.lane.b32.xlu1 %v2857_v12, %s3544_s30  ;;  %v1057_v21 = vpop.f32.mrb[25].mxu0 }
 0x30f   : > { %1730 = vrot.lane.b32.xlu0 %v1037_v13, %s3544_s30  ;;  %v3053_v22 = vpop.f32.mrb[68].mxu1 }
 0x310   : > { %v1671_v23 = vpop.f32.mrb[69].mxu1 }
 0x311   : > { %v2866_v24 = vpop.f32.mrb[26].mxu0 }
 0x312   : > { %1912 = vrot.lane.b32.xlu1 %v2976_v10, %s3543_s18  ;;  %v1067_v25 = vpop.f32.mrb[27].mxu0 }
 0x313   : > { %1910 = vrot.lane.b32.xlu0 %v1424_v11, %s3543_s18  ;;  %v3056_v26 = vpop.f32.mrb[70].mxu1 }
 0x314   : > { %v1681_v27 = vpop.f32.mrb[71].mxu1 }
 0x315   : > { %v2869_v28 = vpop.f32.mrb[28].mxu0 }
 0x316   : > { %1736 = vrot.lane.b32.xlu1 %v2860_v16, %s3544_s30  ;;  %v1077_v29 = vpop.f32.mrb[29].mxu0 }
 0x317   : > { %1734 = vrot.lane.b32.xlu0 %v1047_v17, %s3544_s30 }
 0x319   : > { %v2872_v30 = vpop.f32.mrb[30].mxu0 }
 0x31a   : > { %2028 = vrot.lane.b32.xlu1 %v3047_v14, %s3545_s21  ;;  %v1087_v31 = vpop.f32.mrb[31].mxu0 }
 0x31b   : > { %1738 = vrot.lane.b32.xlu0 %v1057_v21, %s3544_s30 }
 0x31d   : > { %v2875_v32 = vpop.f32.mrb[32].mxu0 }
 0x31e   : > { %2026 = vrot.lane.b32.xlu1 %v1651_v15, %s3545_s21  ;;  %v1097_v35 = vpop.f32.mrb[33].mxu0 }
 0x31f   : > { %1742 = vrot.lane.b32.xlu0 %v1067_v25, %s3544_s30 }
 0x321   : > { %v2878_v36 = vpop.f32.mrb[34].mxu0 }
 0x322   : > { %1740 = vrot.lane.b32.xlu1 %v2863_v20, %s3544_s30  ;;  %v1107_v39 = vpop.f32.mrb[35].mxu0 }
 0x323   : > { %1746 = vrot.lane.b32.xlu0 %v1077_v29, %s3544_s30 }
 0x325   : > { %v2881_v40 = vpop.f32.mrb[36].mxu0 }
 0x326   : > { %2032 = vrot.lane.b32.xlu1 %v3050_v18, %s3545_s21  ;;  %v1117_v43 = vpop.f32.mrb[37].mxu0 }
 0x327   : > { %1750 = vrot.lane.b32.xlu0 %v1087_v31, %s3544_s30 }
 0x329   : > { %v2884_v44 = vpop.f32.mrb[38].mxu0 }
 0x32a   : > { %2030 = vrot.lane.b32.xlu1 %v1661_v19, %s3545_s21  ;;  %v1127_v47 = vpop.f32.mrb[39].mxu0 }
 0x32b   : > { %1754 = vrot.lane.b32.xlu0 %v1097_v35, %s3544_s30 }
 0x32d   : > { %v2887_v8 = vpop.f32.mrb[40].mxu0 }
 0x32e   : > { %1744 = vrot.lane.b32.xlu1 %v2866_v24, %s3544_s30  ;;  %v1137_v9 = vpop.f32.mrb[41].mxu0 }
 0x32f   : > { %1758 = vrot.lane.b32.xlu0 %v1107_v39, %s3544_s30 }
 0x331   : > { %v2890_v10 = vpop.f32.mrb[42].mxu0 }
 0x332   : > { %2036 = vrot.lane.b32.xlu1 %v3053_v22, %s3545_s21  ;;  %v1147_v11 = vpop.f32.mrb[43].mxu0 }
 0x333   : > { %1762 = vrot.lane.b32.xlu0 %v1117_v43, %s3544_s30 }
 0x335   : > { %v4257_v12 = vpop.f32.mrb[44].mxu0 }
 0x336   : > { %2034 = vrot.lane.b32.xlu1 %v1671_v23, %s3545_s21  ;;  %v1157_v13 = vpop.f32.mrb[45].mxu0 }
 0x337   : > { %1766 = vrot.lane.b32.xlu0 %v1127_v47, %s3544_s30 }
 0x339   : > { %v4261_v14 = vpop.permute.xlu1 %1852  ;;  %v4263_v15 = vpop.f32.mrb[46].mxu0 }
 0x33a   : > { %1748 = vrot.lane.b32.xlu1 %v2869_v28, %s3544_s30  ;;  %v4266_v16 = vpop.permute.xlu0 %1850  ;;  %v1167_v17 = vpop.f32.mrb[47].mxu0 }
 0x33b   : > { %1770 = vrot.lane.b32.xlu0 %v1137_v9, %s3544_s30 }
 0x33d   : > { %v4269_v18 = vpop.permute.xlu1 %1856  ;;  %v4271_v19 = vpop.f32.mrb[48].mxu0 }
 0x33e   : > { %2040 = vrot.lane.b32.xlu1 %v3056_v26, %s3545_s21  ;;  %v4274_v20 = vpop.permute.xlu0 %1854  ;;  %v1531_v21 = vpop.f32.mrb[49].mxu0 }
 0x33f   : > { %1774 = vrot.lane.b32.xlu0 %v1147_v11, %s3544_s30 }
 0x341   : > { %v4277_v22 = vpop.permute.xlu1 %1860  ;;  %v4279_v23 = vpop.f32.mrb[50].mxu0 }
 0x342   : > { %2038 = vrot.lane.b32.xlu1 %v1681_v27, %s3545_s21  ;;  %v4282_v24 = vpop.permute.xlu0 %1858  ;;  %v1541_v25 = vpop.f32.mrb[51].mxu0 }
 0x343   : > { %1778 = vrot.lane.b32.xlu0 %v1157_v13, %s3544_s30 }
 0x345   : > { %v4285_v28 = vpop.permute.xlu1 %1864  ;;  %v4287_v29 = vpop.f32.mrb[52].mxu0 }
 0x346   : > { %4776 = vst [vmem:[#allocation22_spill] sm:$0xff] %v4285_v28  ;;  %1752 = vrot.lane.b32.xlu1 %v2872_v30, %s3544_s30  ;;  %v4290_v26 = vpop.permute.xlu0 %1862  ;;  %v1551_v31 = vpop.f32.mrb[53].mxu0 }
 0x347   : > { %1782 = vrot.lane.b32.xlu0 %v1167_v17, %s3544_s30 }
 0x349   : > { %v4293_v35 = vpop.permute.xlu1 %1868  ;;  %v3020_v39 = vpop.f32.mrb[54].mxu0 }
 0x34a   : > { %4777 = vst [vmem:[#allocation23_spill] sm:$0xff] %v4293_v35  ;;  %1756 = vrot.lane.b32.xlu1 %v2875_v32, %s3544_s30  ;;  %v4296_v27 = vpop.permute.xlu0 %1866  ;;  %v1561_v43 = vpop.f32.mrb[55].mxu0 }
 0x34b   : > { %4778 = vst [vmem:[#allocation24_spill] sm:$0xff] %v4296_v27  ;;  %1978 = vrot.lane.b32.xlu0 %v1531_v21, %s3545_s21 }
 0x34d   : > { %v4299_v47 = vpop.permute.xlu1 %1872  ;;  %v3023_v9 = vpop.f32.mrb[56].mxu0 }
 0x34e   : > { %4779 = vst [vmem:[#allocation25_spill] sm:$0xff] %v4299_v47  ;;  %1760 = vrot.lane.b32.xlu1 %v2878_v36, %s3544_s30  ;;  %v4302_v30 = vpop.permute.xlu0 %1870  ;;  %v1571_v11 = vpop.f32.mrb[57].mxu0 }
 0x34f   : > { %1982 = vrot.lane.b32.xlu0 %v1541_v25, %s3545_s21 }
 0x351   : > { %v3026_v13 = vpop.f32.mrb[58].mxu0 }
 0x352   : > { %1764 = vrot.lane.b32.xlu1 %v2881_v40, %s3544_s30  ;;  %v4306_v17 = vpop.permute.xlu1 %1876  ;;  %v1581_v32 = vpop.f32.mrb[59].mxu0 }
 0x353   : > { %4780 = vst [vmem:[#allocation26_spill] sm:$0xff] %v4306_v17  ;;  %1986 = vrot.lane.b32.xlu0 %v1551_v31, %s3545_s21  ;;  %v4309_v60 = vpop.permute.xlu0 %1874 }
 0x355   : > { %v3029_v21 = vpop.f32.mrb[60].mxu0 }
 0x356   : > { %1768 = vrot.lane.b32.xlu1 %v2884_v44, %s3544_s30  ;;  %v4312_v47 = vpop.permute.xlu1 %1880  ;;  %v1591_v36 = vpop.f32.mrb[61].mxu0 }
 0x357   : > { %4781 = vst [vmem:[#allocation27_spill] sm:$0xff] %v4312_v47  ;;  %1992 = vrot.lane.b32.xlu0 %v3020_v39, %s3545_s21  ;;  %v4315_v35 = vpop.permute.xlu0 %1878 }
 0x359   : > { %v3032_v25 = vpop.f32.mrb[62].mxu0 }
 0x35a   : > { %1772 = vrot.lane.b32.xlu1 %v2887_v8, %s3544_s30  ;;  %v4318_v40 = vpop.permute.xlu1 %1884  ;;  %v1601_v17 = vpop.f32.mrb[63].mxu0 }
 0x35b   : > { %4782 = vst [vmem:[#allocation28_spill] sm:$0xff] %v4318_v40  ;;  %1990 = vrot.lane.b32.xlu0 %v1561_v43, %s3545_s21  ;;  %v4321_v31 = vpop.permute.xlu0 %1882 }
 0x35d   : > { %v3035_v58 = vpop.f32.mrb[64].mxu0 }
 0x35e   : > { %1776 = vrot.lane.b32.xlu1 %v2890_v10, %s3544_s30  ;;  %v4324_v44 = vpop.permute.xlu1 %1888  ;;  %v1611_v47 = vpop.f32.mrb[65].mxu0 }
 0x35f   : > { %4783 = vst [vmem:[#allocation29_spill] sm:$0xff] %v4324_v44  ;;  %1996 = vrot.lane.b32.xlu0 %v3023_v9, %s3545_s21  ;;  %v4327_v39 = vpop.permute.xlu0 %1886 }
 0x361   : > { %v3038_v27 = vpop.f32.mrb[66].mxu0 }
 0x362   : > { %1780 = vrot.lane.b32.xlu1 %v4257_v12, %s3544_s30  ;;  %v4331_v8 = vpop.permute.xlu1 %1892  ;;  %v1621_v40 = vpop.f32.mrb[67].mxu0 }
 0x363   : > { %4784 = vst [vmem:[#allocation30_spill] sm:$0xff] %v4331_v8  ;;  %1994 = vrot.lane.b32.xlu0 %v1571_v11, %s3545_s21  ;;  %v4334_v43 = vpop.permute.xlu0 %1890 }
 0x365   : > { %v3041_v28 = vpop.f32.mrb[68].mxu0 }
 0x366   : > { %1784 = vrot.lane.b32.xlu1 %v4263_v15, %s3544_s30  ;;  %v4338_v10 = vpop.permute.xlu1 %1896  ;;  %v1631_v9 = vpop.f32.mrb[69].mxu0 }
 0x367   : > { %4785 = vst [vmem:[#allocation31_spill] sm:$0xff] %v4338_v10  ;;  %2000 = vrot.lane.b32.xlu0 %v3026_v13, %s3545_s21  ;;  %v4341_v44 = vpop.permute.xlu0 %1894 }
 0x369   : > { %v3044_v56 = vpop.f32.mrb[70].mxu0 }
 0x36a   : > { %1980 = vrot.lane.b32.xlu1 %v4271_v19, %s3545_s21  ;;  %v4345_v12 = vpop.permute.xlu1 %1900  ;;  %v1641_v11 = vpop.f32.mrb[71].mxu0 }
 0x36b   : > { %1998 = vrot.lane.b32.xlu0 %v1581_v32, %s3545_s21  ;;  %v4348_v8 = vpop.permute.xlu0 %1898 }
 0x36e   : > { %1984 = vrot.lane.b32.xlu1 %v4279_v23, %s3545_s21 }
 0x36f   : > { %2004 = vrot.lane.b32.xlu0 %v3029_v21, %s3545_s21 }
 0x370   : > { %v1725_v15 = vpop.permute.xlu1 %1724 }
 0x371   : > { %v2076_v13 = vsel %vm2074_vm0, %v4132_v33, %v1725_v15  ;;  %v1723_v10 = vpop.permute.xlu0 %1722 }
 0x372   : > { %v2075_v19 = vsel %vm2074_vm0, %v4134_v34, %v1723_v10  ;;  %1988 = vrot.lane.b32.xlu1 %v4287_v29, %s3545_s21  ;;  %v4361_v32 = vsel %vm2107_vm1, %v2076_v13, %v4261_v14 }
 0x373   : > { %2002 = vrot.lane.b32.xlu0 %v1591_v36, %s3545_s21  ;;  %v4366_v23 = vsel %vm2107_vm1, %v2075_v19, %v4266_v16 }
 0x374   : > { %v4368_v21 = vpop.permute.xlu1 %1904 }
 0x375   : > { %v4370_v33 = vpop.permute.xlu0 %1902 }
 0x376   : > { %2012 = vrot.lane.b32.xlu1 %v3035_v58, %s3545_s21 }
 0x377   : > { %2008 = vrot.lane.b32.xlu0 %v3032_v25, %s3545_s21 }
 0x378   : > { %v1729_v34 = vpop.permute.xlu1 %1728 }
 0x379   : > { %v2078_v29 = vsel %vm2074_vm0, %v4138_v37, %v1729_v34  ;;  %v1727_v14 = vpop.permute.xlu0 %1726 }
 0x37a   : > { %v2077_v36 = vsel %vm2074_vm0, %v4140_v38, %v1727_v14  ;;  %2016 = vrot.lane.b32.xlu1 %v3038_v27, %s3545_s21  ;;  %v4381_v16 = vsel %vm2107_vm1, %v2078_v29, %v4269_v18 }
 0x37b   : > { %2006 = vrot.lane.b32.xlu0 %v1601_v17, %s3545_s21  ;;  %v4386_v58 = vsel %vm2107_vm1, %v2077_v36, %v4274_v20 }
 0x37c   : > { %v4388_v25 = vpop.permute.xlu1 %1908 }
 0x37d   : > { %v4390_v10 = vpop.permute.xlu0 %1906 }
 0x37e   : > { %2020 = vrot.lane.b32.xlu1 %v3041_v28, %s3545_s21 }
 0x37f   : > { %2010 = vrot.lane.b32.xlu0 %v1611_v47, %s3545_s21 }
 0x380   : > { %v1733_v37 = vpop.permute.xlu1 %1732 }
 0x381   : > { %v2080_v38 = vsel %vm2074_vm0, %v4144_v41, %v1733_v37  ;;  %v1731_v18 = vpop.permute.xlu0 %1730 }
 0x382   : > { %v2079_v27 = vsel %vm2074_vm0, %v4146_v42, %v1731_v18  ;;  %2024 = vrot.lane.b32.xlu1 %v3044_v56, %s3545_s21  ;;  %v4401_v20 = vsel %vm2107_vm1, %v2080_v38, %v4277_v22 }
 0x383   : > { %2014 = vrot.lane.b32.xlu0 %v1621_v40, %s3545_s21  ;;  %v4406_v28 = vsel %vm2107_vm1, %v2079_v27, %v4282_v24 }
 0x384   : > { %v4408_v47 = vpop.permute.xlu1 %1912 }
 0x385   : > { %v4410_v17 = vpop.permute.xlu0 %1910 }
 0x386   : > { %2022 = vrot.lane.b32.xlu1 %v1641_v11, %s3545_s21 }
 0x387   : > { %2018 = vrot.lane.b32.xlu0 %v1631_v9, %s3545_s21 }
 0x388   : > { %v1737_v41 = vpop.permute.xlu1 %1736 }
 0x389   : > { %v4416_v42 = vsel %vm2074_vm0, %v4150_v45, %v1737_v41  ;;  %v1735_v56 = vpop.permute.xlu0 %1734 }
 0x38a   : > { %v4420_v22 = vsel %vm2074_vm0, %v4152_v46, %v1735_v56 }
 0x38c   : > { %v4422_v24 = vpop.permute.xlu1 %2028 }
 0x38d   : > { %v1739_v40 = vpop.permute.xlu0 %1738 }
 0x38e   : > { %v4426_v15 = vsel %vm2074_vm0, %v4157_v49, %v1739_v40 }
 0x390   : > { %v2027_v11 = vpop.permute.xlu1 %2026 }
 0x391   : > { %v1743_v13 = vpop.permute.xlu0 %1742 }
 0x392   : > { %v2085_v9 = vsel %vm2074_vm0, %v4161_v51, %v1743_v13 }
 0x393   : > { %v4432_v45 = vsel %vm2107_vm1, %v2085_v9, %v4302_v30 }
 0x394   : > { %v1741_v19 = vpop.permute.xlu1 %1740 }
 0x395   : > { %v4436_v46 = vsel %vm2074_vm0, %v4155_v48, %v1741_v19  ;;  %v1747_v34 = vpop.permute.xlu0 %1746 }
 0x396   : > { %v2087_v29 = vsel %vm2074_vm0, %v4165_v53, %v1747_v34 }
 0x397   : > { %v4442_v49 = vsel %vm2107_vm1, %v2087_v29, %v4309_v60 }
 0x398   : > { %v4444_v14 = vpop.permute.xlu1 %2032 }
 0x399   : > { %v1751_v51 = vpop.permute.xlu0 %1750 }
 0x39a   : > { %v2089_v30 = vsel %vm2074_vm0, %v4169_v55, %v1751_v51 }
 0x39b   : > { %v4450_v36 = vsel %vm2107_vm1, %v2089_v30, %v4315_v35 }
 0x39c   : > { %v2031_v48 = vpop.permute.xlu1 %2030 }
 0x39d   : > { %v1755_v37 = vpop.permute.xlu0 %1754 }
 0x39e   : > { %v2091_v38 = vsel %vm2074_vm0, %v4173_v57, %v1755_v37 }
 0x39f   : > { %v4456_v53 = vsel %vm2107_vm1, %v2091_v38, %v4321_v31 }
 0x3a0   : > { %v1745_v60 = vpop.permute.xlu1 %1744 }
 0x3a1   : > { %v4460_v18 = vsel %vm2074_vm0, %v4159_v50, %v1745_v60  ;;  %v1759_v27 = vpop.permute.xlu0 %1758 }
 0x3a2   : > { %v2093_v55 = vsel %vm2074_vm0, %v4177_v59, %v1759_v27 }
 0x3a3   : > { %v4466_v35 = vsel %vm2107_vm1, %v2093_v55, %v4327_v39  ;;  %v4516_v55 = vstv %s597_s23 }
 0x3a4   : > { %v2037_v41 = vpop.permute.xlu1 %2036 }
 0x3a5   : > { %v1763_v56 = vpop.permute.xlu0 %1762 }
 0x3a6   : > { %v2095_v57 = vsel %vm2074_vm0, %v4181_v61, %v1763_v56 }
 0x3a7   : > { %v4472_v31 = vsel %vm2107_vm1, %v2095_v57, %v4334_v43 }
 0x3a8   : > { %v2035_v40 = vpop.permute.xlu1 %2034 }
 0x3a9   : > { %v1767_v50 = vpop.permute.xlu0 %1766 }
 0x3aa   : > { %v2097_v13 = vsel %vm2074_vm0, %v4185_v63, %v1767_v50 }
 0x3ab   : > { %v4478_v59 = vsel %vm2107_vm1, %v2097_v13, %v4341_v44 }
 0x3ac   : > { %v1749_v39 = vpop.permute.xlu1 %1748 }
 0x3ad   : > { %v4482_v9 = vsel %vm2074_vm0, %v4163_v52, %v1749_v39  ;;  %v1771_v19 = vpop.permute.xlu0 %1770 }
 0x3ae   : > { %v2099_v61 = vsel %vm2074_vm0, %v4189_v1, %v1771_v19 }
 0x3af   : > { %v2132_v43 = vsel %vm2107_vm1, %v2099_v61, %v4348_v8 }
 0x3b0   : > { %v2041_v34 = vpop.permute.xlu1 %2040  ;;  %v4489_v63 = vsel %vm2140_vm2, %v2132_v43, %v2027_v11 }
 0x3b1   : > { %v1775_v29 = vpop.permute.xlu0 %1774 }
 0x3b2   : > { %v2101_v44 = vsel %vm2074_vm0, %v4193_v3, %v1775_v29 }
 0x3b3   : > { %v2134_v52 = vsel %vm2107_vm1, %v2101_v44, %v4370_v33 }
 0x3b4   : > { %v2039_v51 = vpop.permute.xlu1 %2038  ;;  %v4496_v30 = vsel %vm2140_vm2, %v2134_v52, %v2031_v48 }
 0x3b5   : > { %v1779_v37 = vpop.permute.xlu0 %1778 }
 0x3b6   : > { %v2103_v1 = vsel %vm2074_vm0, %v4197_v5, %v1779_v37 }
 0x3b7   : > { %v2136_v8 = vsel %vm2107_vm1, %v2103_v1, %v4390_v10 }
 0x3b8   : > { %v1753_v11 = vpop.permute.xlu1 %1752  ;;  %v4503_v38 = vsel %vm2140_vm2, %v2136_v8, %v2035_v40 }
 0x3b9   : > { %v4507_v3 = vsel %vm2074_vm0, %v4167_v54, %v1753_v11  ;;  %v1783_v33 = vpop.permute.xlu0 %1782 }
 0x3ba   : > { %v2105_v48 = vsel %vm2074_vm0, %v4201_v7, %v1783_v33 }
 0x3bb   : > { %v2138_v60 = vsel %vm2107_vm1, %v2105_v48, %v4410_v17 }
 0x3bc   : > { %v1757_v5 = vpop.permute.xlu1 %1756  ;;  %v4514_v27 = vsel %vm2140_vm2, %v2138_v60, %v2039_v51 }
 0x3bd   : > { %v1979_v10 = vpop.permute.xlu0 %1978 }
 0x3be   : > { %v2141_v56 = vsel %vm2140_vm2, %v4366_v23, %v1979_v10 }
 0x3bf   : > { %v2174_v54 = vadd.f32 %v4516_v55, %v2141_v56 }
 0x3c0   : > { %v4521_v57 = vpop.permute.xlu1 %1760 }
 0x3c1   : > { %2206 = vxpose.xlu0.b32.start [1/16] (narrow) %v2174_v54, 8  ;;  %v1983_v40 = vpop.permute.xlu0 %1982 }
 0x3c2   : > { %v2143_v60 = vsel %vm2140_vm2, %v4386_v58, %v1983_v40 }
 0x3c3   : > { %v2176_v56 = vadd.f32 %v4516_v55, %v2143_v60 }
 0x3c4   : > { %v4523_v7 = vpop.permute.xlu1 %1764 }
 0x3c5   : > { %v1987_v50 = vpop.permute.xlu0 %1986 }
 0x3c6   : > { %v2145_v54 = vsel %vm2140_vm2, %v4406_v28, %v1987_v50  ;;  %v4786_v50 = vld [vmem:[#allocation19_spill] sm:$0xff] }
 0x3c7   : > { %v2178_v40 = vadd.f32 %v4516_v55, %v2145_v54  ;;  %v4792_v54 = vld [vmem:[#allocation29_spill] sm:$0xff] }
 0x3c8   : > { %v1769_v17 = vpop.permute.xlu1 %1768 }
 0x3c9   : > { %v4527_v13 = vsel %vm2074_vm0, %v4183_v62, %v1769_v17  ;;  %v1993_v39 = vpop.permute.xlu0 %1992 }
 0x3cc   : > { %v1773_v19 = vpop.permute.xlu1 %1772 }
 0x3cd   : > { %v2100_v61 = vsel %vm2074_vm0, %v4187_v0, %v1773_v19  ;;  %v1991_v23 = vpop.permute.xlu0 %1990 }
 0x3ce   : > { %v2133_v43 = vsel %vm2107_vm1, %v2100_v61, %v4345_v12 }
 0x3cf   : > { %v4535_v29 = vsel %vm2140_vm2, %v2133_v43, %v4422_v24  ;;  %v2114_v43 = vsel %vm2107_vm1, %v4420_v22, %v4290_v26  ;;  %v4788_v22 = vld [vmem:[#allocation28_spill] sm:$0xff] }
 0x3d0   : > { %v1777_v44 = vpop.permute.xlu1 %1776  ;;  %v2147_v28 = vsel %vm2140_vm2, %v2114_v43, %v1991_v23 }
 0x3d1   : > { %v2102_v52 = vsel %vm2074_vm0, %v4191_v2, %v1777_v44  ;;  %v4539_v51 = vpop.permute.xlu0 %1996 }
 0x3d2   : > { %v2135_v62 = vsel %vm2107_vm1, %v2102_v52, %v4368_v21  ;;  %v2092_v52 = vsel %vm2074_vm0, %v4786_v50, %v1757_v5  ;;  %v4794_v50 = vld [vmem:[#allocation25_spill] sm:$0xff] }
 0x3d3   : > { %v4545_v0 = vsel %vm2140_vm2, %v2135_v62, %v4444_v14 }
 0x3d4   : > { %v1781_v37 = vpop.permute.xlu1 %1780 }
 0x3d5   : > { %v2104_v12 = vsel %vm2074_vm0, %v4195_v4, %v1781_v37  ;;  %v1995_v1 = vpop.permute.xlu0 %1994  ;;  %v4787_v37 = vld [vmem:[#allocation22_spill] sm:$0xff] }
 0x3d6   : > { %v2137_v24 = vsel %vm2107_vm1, %v2104_v12, %v4388_v25  ;;  %v2180_v12 = vadd.f32 %v4516_v55, %v2147_v28 }
 0x3d7   : > { %v4552_v8 = vsel %vm2140_vm2, %v2137_v24, %v2037_v41 }
 0x3d8   : > { %v1785_v2 = vpop.permute.xlu1 %1784 }
 0x3d9   : > { %v2106_v11 = vsel %vm2074_vm0, %v4199_v6, %v1785_v2  ;;  %v4556_v21 = vpop.permute.xlu0 %2000  ;;  %v2125_v2 = vsel %vm2107_vm1, %v2092_v52, %v4788_v22  ;;  %v2119_v52 = vsel %vm2107_vm1, %v4460_v18, %v4794_v50 }
 0x3da   : > { %v2139_v14 = vsel %vm2107_vm1, %v2106_v11, %v4408_v47 }
 0x3db   : > { %v4561_v33 = vsel %vm2140_vm2, %v2139_v14, %v2041_v34 }
 0x3dc   : > { %v1981_v4 = vpop.permute.xlu1 %1980 }
 0x3dd   : > { %v2142_v48 = vsel %vm2140_vm2, %v4361_v32, %v1981_v4  ;;  %v1999_v25 = vpop.permute.xlu0 %1998  ;;  %v4789_v4 = vld [vmem:[#allocation24_spill] sm:$0xff] }
 0x3de   : > { %v2175_v41 = vadd.f32 %v4516_v55, %v2142_v48  ;;  %v2116_v48 = vsel %vm2107_vm1, %v4426_v15, %v4789_v4 }
 0x3e0   : > { %2207 = vxpose.xlu0.b32.cont [2/16] (narrow) %v2175_v41, 8  ;;  %v1985_v6 = vpop.permute.xlu1 %1984  ;;  %v4790_v41 = vld [vmem:[#allocation20_spill] sm:$0xff] }
 0x3e1   : > { %v4568_v10 = vpop.permute.xlu0 %2004  ;;  %v2144_v47 = vsel %vm2140_vm2, %v4381_v16, %v1985_v6  ;;  %v2094_v60 = vsel %vm2074_vm0, %v4790_v41, %v4521_v57 }
 0x3e2   : > { %v2177_v32 = vadd.f32 %v4516_v55, %v2144_v47  ;;  %v4791_v47 = vld [vmem:[#allocation23_spill] sm:$0xff] }
 0x3e4   : > { %2208 = vxpose.xlu0.b32.cont [3/16] (narrow) %v2176_v56, 8  ;;  %v1989_v17 = vpop.permute.xlu1 %1988 }
 0x3e5   : > { %v4573_v34 = vpop.permute.xlu0 %2002  ;;  %v2146_v19 = vsel %vm2140_vm2, %v4401_v20, %v1989_v17  ;;  %v2115_v20 = vsel %vm2107_vm1, %v4416_v42, %v4787_v37  ;;  %v2127_v17 = vsel %vm2107_vm1, %v2094_v60, %v4792_v54 }
 0x3e6   : > { %v2179_v44 = vadd.f32 %v4516_v55, %v2146_v19  ;;  %v2148_v26 = vsel %vm2140_vm2, %v2115_v20, %v1993_v39  ;;  %v2153_v18 = vsel %vm2140_vm2, %v4442_v49, %v4573_v34 }
 0x3e7   : > { %v2181_v42 = vadd.f32 %v4516_v55, %v2148_v26  ;;  %v4796_v26 = vld [vmem:[#allocation26_spill] sm:$0xff] }
 0x3e8   : > { %2209 = vxpose.xlu0.b32.cont [4/16] (narrow) %v2177_v32, 8  ;;  %v2013_v61 = vpop.permute.xlu1 %2012  ;;  %v2117_v32 = vsel %vm2107_vm1, %v4436_v46, %v4791_v47  ;;  %v2151_v46 = vsel %vm2140_vm2, %v4432_v45, %v1999_v25  ;;  %v2152_v45 = vsel %vm2140_vm2, %v2119_v52, %v4556_v21  ;;  %v4795_v25 = vld [vmem:[#allocation30_spill] sm:$0xff]  ;;  %v2121_v22 = vsel %vm2107_vm1, %v4482_v9, %v4796_v26 }
 0x3e9   : > { %v4578_v58 = vpop.permute.xlu0 %2008  ;;  %v2158_v5 = vsel %vm2140_vm2, %v2125_v2, %v2013_v61  ;;  %v2186_v2 = vadd.f32 %v4516_v55, %v2153_v18 }
 0x3ea   : > { %v2191_v39 = vadd.f32 %v4516_v55, %v2158_v5 }
 0x3ec   : > { %2210 = vxpose.xlu0.b32.cont [5/16] (narrow) %v2178_v40, 8  ;;  %v2017_v23 = vpop.permute.xlu1 %2016 }
 0x3ed   : > { %v4583_v16 = vpop.permute.xlu0 %2006  ;;  %v2160_v40 = vsel %vm2140_vm2, %v2127_v17, %v2017_v23  ;;  %v2154_v23 = vsel %vm2140_vm2, %v2121_v22, %v4568_v10  ;;  %v4798_v10 = vld [vmem:[#allocation27_spill] sm:$0xff] }
 0x3ee   : > { %v2193_v61 = vadd.f32 %v4516_v55, %v2160_v40  ;;  %v2155_v9 = vsel %vm2140_vm2, %v4450_v36, %v4583_v16  ;;  %v2199_v16 = vadd.f32 %v4516_v55, %v4535_v29  ;;  %v2204_v29 = vadd.f32 %v4516_v55, %v4514_v27 }
 0x3f0   : > { %2211 = vxpose.xlu0.b32.cont [6/16] (narrow) %v2179_v44, 8  ;;  %v2021_v56 = vpop.permute.xlu1 %2020 }
 0x3f1   : > { %v2011_v62 = vpop.permute.xlu0 %2010 }
 0x3f2   : > { %v2157_v24 = vsel %vm2140_vm2, %v4456_v53, %v2011_v62  ;;  %v2149_v53 = vsel %vm2140_vm2, %v2116_v48, %v1995_v1  ;;  %v2150_v1 = vsel %vm2140_vm2, %v2117_v32, %v4539_v51  ;;  %v4793_v51 = vld [vmem:[#allocation21_spill] sm:$0xff]  ;;  %v2184_v62 = vadd.f32 %v4516_v55, %v2151_v46 }
 0x3f3   : > { %v2190_v11 = vadd.f32 %v4516_v55, %v2157_v24  ;;  %v2182_v15 = vadd.f32 %v4516_v55, %v2149_v53  ;;  %v2183_v19 = vadd.f32 %v4516_v55, %v2150_v1  ;;  %v2096_v44 = vsel %vm2074_vm0, %v4793_v51, %v4523_v7 }
 0x3f4   : > { %2212 = vxpose.xlu0.b32.cont [7/16] (narrow) %v2180_v12, 8  ;;  %v2025_v43 = vpop.permute.xlu1 %2024  ;;  %v2129_v37 = vsel %vm2107_vm1, %v2096_v44, %v4795_v25  ;;  %v2185_v12 = vadd.f32 %v4516_v55, %v2152_v45  ;;  %v2198_v48 = vadd.f32 %v4516_v55, %v4489_v63  ;;  %v2202_v63 = vadd.f32 %v4516_v55, %v4503_v38 }
 0x3f5   : > { %v2015_v14 = vpop.permute.xlu0 %2014  ;;  %2238 = vxpose.xlu1.b32.start [1/16] (narrow) %v2190_v11, 8  ;;  %v2162_v7 = vsel %vm2140_vm2, %v2129_v37, %v2021_v56  ;;  %v4797_v11 = vld [vmem:[#allocation31_spill] sm:$0xff]  ;;  %v2203_v53 = vadd.f32 %v4516_v55, %v4552_v8 }
 0x3f6   : > { %v2159_v6 = vsel %vm2140_vm2, %v4466_v35, %v2015_v14  ;;  %v2195_v24 = vadd.f32 %v4516_v55, %v2162_v7  ;;  %v2131_v49 = vsel %vm2107_vm1, %v4527_v13, %v4797_v11  ;;  %v2123_v13 = vsel %vm2107_vm1, %v4507_v3, %v4798_v10 }
 0x3f7   : > { %v2192_v57 = vadd.f32 %v4516_v55, %v2159_v6  ;;  %v2164_v5 = vsel %vm2140_vm2, %v2131_v49, %v2025_v43  ;;  %v2156_v4 = vsel %vm2140_vm2, %v2123_v13, %v4578_v58  ;;  %v2200_v3 = vadd.f32 %v4516_v55, %v4496_v30 }
 0x3f8   : > { %2213 = vxpose.xlu0.b32.cont [8/16] (narrow) %v2181_v42, 8  ;;  %v2197_v14 = vadd.f32 %v4516_v55, %v2164_v5  ;;  %v2188_v42 = vadd.f32 %v4516_v55, %v2155_v9  ;;  %v2189_v36 = vadd.f32 %v4516_v55, %v2156_v4  ;;  %v2201_v58 = vadd.f32 %v4516_v55, %v4545_v0 }
 0x3f9   : > { %2239 = vxpose.xlu1.b32.cont [2/16] (narrow) %v2191_v39, 8  ;;  %v2019_v35 = vpop.permute.xlu0 %2018  ;;  %v2205_v30 = vadd.f32 %v4516_v55, %v4561_v33 }
 0x3fa   : > { %v2161_v28 = vsel %vm2140_vm2, %v4472_v31, %v2019_v35  ;;  %v2023_v31 = vpop.permute.xlu1 %2022 }
 0x3fb   : > { %v2194_v20 = vadd.f32 %v4516_v55, %v2161_v28  ;;  %v2163_v21 = vsel %vm2140_vm2, %v4478_v59, %v2023_v31  ;;  %v2187_v59 = vadd.f32 %v4516_v55, %v2154_v23 }
 0x3fc   : > { %2214 = vxpose.xlu0.b32.cont [9/16] (narrow) %v2182_v15, 8  ;;  %v2196_v34 = vadd.f32 %v4516_v55, %v2163_v21 }
 0x3fd   : > { %2240 = vxpose.xlu1.b32.cont [3/16] (narrow) %v2192_v57, 8 }
 0x400   : > { %2215 = vxpose.xlu0.b32.cont [10/16] (narrow) %v2183_v19, 8 }
 0x401   : > { %2241 = vxpose.xlu1.b32.cont [4/16] (narrow) %v2193_v61, 8 }
 0x404   : > { %2216 = vxpose.xlu0.b32.cont [11/16] (narrow) %v2184_v62, 8 }
 0x405   : > { %2242 = vxpose.xlu1.b32.cont [5/16] (narrow) %v2194_v20, 8 }
 0x408   : > { %2217 = vxpose.xlu0.b32.cont [12/16] (narrow) %v2185_v12, 8 }
 0x409   : > { %2243 = vxpose.xlu1.b32.cont [6/16] (narrow) %v2195_v24, 8 }
 0x40c   : > { %2218 = vxpose.xlu0.b32.cont [13/16] (narrow) %v2186_v2, 8 }
 0x40d   : > { %2244 = vxpose.xlu1.b32.cont [7/16] (narrow) %v2196_v34, 8 }
 0x410   : > { %2219 = vxpose.xlu0.b32.cont [14/16] (narrow) %v2187_v59, 8 }
 0x411   : > { %2245 = vxpose.xlu1.b32.cont [8/16] (narrow) %v2197_v14, 8 }
 0x414   : > { %2220 = vxpose.xlu0.b32.cont [15/16] (narrow) %v2188_v42, 8 }
 0x415   : > { %2246 = vxpose.xlu1.b32.cont [9/16] (narrow) %v2198_v48, 8 }
 0x418   : > { %2221 = vxpose.xlu0.b32.end [16/16] (narrow) %v2189_v36, 8 }
 0x419   : > { %2247 = vxpose.xlu1.b32.cont [10/16] (narrow) %v2199_v16, 8 }
 0x41d   : > { %2248 = vxpose.xlu1.b32.cont [11/16] (narrow) %v2200_v3, 8 }
 0x421   : > { %2249 = vxpose.xlu1.b32.cont [12/16] (narrow) %v2201_v58, 8 }
 0x425   : > { %2250 = vxpose.xlu1.b32.cont [13/16] (narrow) %v2202_v63, 8 }
 0x429   : > { %2251 = vxpose.xlu1.b32.cont [14/16] (narrow) %v2203_v53, 8 }
 0x42d   : > { %2252 = vxpose.xlu1.b32.cont [15/16] (narrow) %v2204_v29, 8 }
 0x431   : > { %2253 = vxpose.xlu1.b32.end [16/16] (narrow) %v2205_v30, 8 }
 0x45c   : > { %v2222_v0 = vpop.trf.xlu0 }
 0x475   : > { %v2254_v38 = vpop.trf.xlu1 }
 0x476   : > { %v2272_v39 = vcombine.low %v2222_v0, %v2254_v38 }
 0x478   : > { %2274 = vst [vmem:[%s414_s10] sm:$0xff] %v2272_v39 }
 0x479   : > { %3473 = shalt.err (!%p3470_p5)
}
 0x47a   : > { %s3474_s9 = scalar_lea.hbm %s4694_s25, 128  ;;  %s3478_s16 = scalar_lea.hbm %s4745_s7, 256 }
 0x47b   : > { %p3475_p1 = scmp.ne.s32.totalorder %s4694_s25, %s3474_s9  ;;  %p3479_p12 = scmp.lt.u32.totalorder %s4694_s25, %s4745_s7 }
 0x47c   : > { %p3480_p2 = scmp.lt.u32.totalorder %s3478_s16, %s3474_s9  ;;  %p3482_p13 = scmp.lt.u32.totalorder %s3474_s9, %s4694_s25 }
 0x47d   : > { %p3476_p7 = pnand %p3475_p1, %p4799_p0 }
 0x47e   : > { %p3481_p6 = por %p3480_p2, %p3479_p12 }
 0x47f   : > { %p3477_p9 = pneg %p3476_p7 }
 0x480   : > { %p3483_p8 = por %p3482_p13, %p3481_p6 }
 0x482   : > { %p3484_p10 = pnand %p3483_p8, %p3477_p9 }
 0x484   : > { %3487 = shalt.err (!%p3484_p10)
}
 0x485   : > { %3241 = dma.vmem_to_hbm [thread:$0]  (%p4799_p0), %s4696_s12, 128, %s4694_s25, %s2276_s15  }
 0x486 PF: > { %s2302_s30 = sand.u32 1, %s3522_s26   ;;  %p4800_p11 = scmp.ne.s32.totalorder %s4762_s14, 0 }
 0x487   : > { %p4801_p4 = scmp.ge.s32.totalorder %s3534_s29, 2  ;;  %s2303_s21 = scalar_lea.sflag [#allocation5], %s2302_s30 }
 0x489   : > { %p3257_p3 = pnand %p4801_p4, %p4800_p11 }
 0x48b   : > { %3517 = dma.done.wait (!%p3257_p3), %s2303_s21, 128  }
 0x48c   : > { %3519 = vsyncadd (!%p3257_p3), %s2303_s21, 4294967168  ;;  %s4802_s29 = sld [smem:[#allocation17_spill]]  ;;  %s4803_s23 = sld [smem:[#allocation16_spill]] }
 0x48d   : > { %s4804_s28 = sld [smem:[#allocation18_spill]]  ;;  %s4805_s26 = smov %s3526_s27 }
 0x492   : > { %p27_p5 = scmp.ge.s32.totalorder %s4802_s29, 4   ;;  %s4806_s27 = smov %s4803_s23 }
 0x494   :  { %29 = sbr.rel (!%p27_p5) target bundleno = 13 (0xd), region = 130 }
 0x49b   :  { %2308 = vsyncpa [#allocation4], 1 }
 0x49c   :  { %2310 = vsyncpa [#allocation4 + $0x1], 1 }
 0x49d   :  { %2311 = vsyncpa [#allocation7], 1 }
 0x49e   :  { %2313 = vsyncpa [#allocation7 + $0x1], 1 }
 0x49f   :  { %2314 = vsyncpa [#allocation10], 1 }
 0x4a0   :  { %2316 = vsyncpa [#allocation10 + $0x1], 1 }
 0x4a1   :  { %2317 = vsyncpa [#allocation5], 1 }
 0x4a2   :  { %2319 = vsyncpa [#allocation5 + $0x1], 1 }

</bundles_post_ra>
